<compile_context>
chip_gen: v6e
topology: v6e:2x2x1
jax: 0.10.0
libtpu: 0.0.40
codegen_flags: <defaults>
</compile_context>

<pallas_src>
import functools

import numpy as np
import jax
import jax.numpy as jnp
from jax.experimental import pallas as pl
from jax.experimental.pallas import tpu as pltpu


def _round_up(v, m):
    return (v + m - 1) // m * m


# ----------------------------------------------------------------------------
# Fused CNNBlock2 forward (x, x0 are NHWC float32)
# ----------------------------------------------------------------------------
def cnnblock2_pallas(params, x, x0, *, bn_eps=1e-4):
    N, H, W, Cn = x.shape
    Ci = x0.shape[-1]
    Cin0 = Ci + Cn
    num_mid = len(params["mid"])

    Hp, Wp = H + 2, W + 2
    F = Hp * Wp                 # padded pixels per image
    T = N * F                   # flattened padded pixels (lane axis of the slab)
    S = Wp + 1                  # max |tap shift|; zero margin on each side
    Tw = T + 2 * S              # slab width incl. margins

    C0p = _round_up(Cin0, 8)    # layer-0 input channels, sublane-padded
    Cop = _round_up(Cn, 8)      # output channels, sublane-padded
    Cslab = max(C0p, Cop)
    inv_cnt = 1.0 / float(N * H * W)   # BN population size per channel

    # ---- one-time input / parameter layout prep (plain JAX glue) -----------
    # activations: channels-first, spatially zero-padded, flattened to a
    # lane-dense (Cslab, Tw) slab; conv taps become constant lane shifts.
    x1 = jnp.concatenate([x0, x], axis=-1).astype(jnp.float32)        # (N,H,W,Cin0)
    xcf = jnp.transpose(x1, (3, 0, 1, 2))                             # (Cin0,N,H,W)
    slab_in = jnp.pad(xcf, ((0, Cslab - Cin0), (0, 0), (1, 1), (1, 1)))
    slab_in = slab_in.reshape(Cslab, T)
    slab_in = jnp.pad(slab_in, ((0, 0), (S, S)))                      # (Cslab, Tw)

    # interior mask: 1 at real output pixels, 0 on the conv padding ring
    m = np.zeros((Hp, Wp), np.float32)
    m[1:-1, 1:-1] = 1.0
    mask = jnp.asarray(np.tile(m.reshape(-1), N).reshape(1, T))

    # weights: (Cout, Cin) per tap, channel-padded, taps flattened to axis 0
    w0t = jnp.transpose(params["w0"], (0, 1, 3, 2))                   # (3,3,Cn,Cin0)
    w0t = jnp.pad(w0t, ((0, 0), (0, 0), (0, Cop - Cn), (0, C0p - Cin0)))
    w0t = w0t.reshape(9, Cop, C0p)
    b0 = jnp.pad(params["b0"], (0, Cop - Cn)).reshape(Cop, 1)

    Lm = max(num_mid, 1)
    if num_mid > 0:
        wm = jnp.stack([jnp.transpose(l["w"], (0, 1, 3, 2)) for l in params["mid"]])
        gm = jnp.stack([l["gamma"] for l in params["mid"]])
        bm = jnp.stack([l["beta"] for l in params["mid"]])
    else:  # dummy (never read by the kernel)
        wm = jnp.zeros((1, 3, 3, Cn, Cn), jnp.float32)
        gm = jnp.ones((1, Cn), jnp.float32)
        bm = jnp.zeros((1, Cn), jnp.float32)
    wmt = jnp.pad(wm, ((0, 0), (0, 0), (0, 0), (0, Cop - Cn), (0, Cop - Cn)))
    wmt = wmt.reshape(Lm * 9, Cop, Cop)
    gamma = jnp.pad(gm, ((0, 0), (0, Cop - Cn))).reshape(Lm, Cop, 1)
    beta = jnp.pad(bm, ((0, 0), (0, Cop - Cn))).reshape(Lm, Cop, 1)

    # static lane shift for each of the 9 taps
    shifts = [(dy - 1) * Wp + (dx - 1) for dy in range(3) for dx in range(3)]

    def kernel(slab_in_ref, mask_ref, w0_ref, b0_ref, wm_ref, g_ref, bt_ref,
               out_ref, slab_ref):
        # whole padded input slab (margins already zero) -> VMEM scratch
        slab_ref[...] = slab_in_ref[...]
        msk = mask_ref[...]                                       # (1, T)

        def conv(weight_at, k_rows):
            acc = jnp.zeros((Cop, T), jnp.float32)
            for t, s in enumerate(shifts):
                a = slab_ref[:k_rows, S + s:S + s + T]            # (k_rows, T)
                acc = acc + jnp.dot(weight_at(t), a,
                                    preferred_element_type=jnp.float32)
            return acc

        # ---- layer 0: conv3x3 + bias + ReLU --------------------------------
        acc = conv(lambda t: w0_ref[t], C0p)
        y = jnp.maximum(acc + b0_ref[...], 0.0) * msk             # re-zero pad ring
        if num_mid == 0:
            out_ref[...] = y
            return
        slab_ref[:Cop, S:S + T] = y

        # ---- mid layers: conv3x3 -> BatchNorm(training stats) -> ReLU ------
        for l in range(num_mid):
            acc = conv(lambda t, l=l: wm_ref[l * 9 + t], Cop)
            macc = acc * msk
            s1 = jnp.sum(macc, axis=1, keepdims=True)             # (Cop,1) sum
            s2 = jnp.sum(macc * acc, axis=1, keepdims=True)       # sum of x^2
            mean = s1 * inv_cnt
            var = s2 * inv_cnt - mean * mean                      # biased variance
            inv = jax.lax.rsqrt(var + bn_eps)
            y = (acc - mean) * (inv * g_ref[l]) + bt_ref[l]
            y = jnp.maximum(y, 0.0) * msk
            if l < num_mid - 1:
                slab_ref[:Cop, S:S + T] = y
            else:
                out_ref[...] = y                                  # lane-dense store

        # NOTE (v6e/v7x): cast matmul operands to bf16 at production channel
        # counts; at C<=16 the block is overhead-bound and f32 is fine.

    vmem = pl.BlockSpec(memory_space=pltpu.MemorySpace.VMEM)
    out_flat = pl.pallas_call(
        kernel,
        out_shape=jax.ShapeDtypeStruct((Cop, T), jnp.float32),
        in_specs=[vmem] * 7,
        out_specs=vmem,
        scratch_shapes=[pltpu.VMEM((Cslab, Tw), jnp.float32)],
    )(slab_in, mask, w0t, b0, wmt, gamma, beta)

    # back to NHWC: strip channel padding + conv padding ring (once, at the end)
    out = out_flat.reshape(Cop, N, Hp, Wp)[:Cn, :, 1:-1, 1:-1]
    return jnp.transpose(out, (1, 2, 3, 0)).astype(x.dtype)


# ----------------------------------------------------------------------------
# Parameters (synthetic init, matching module structure) and pure-JAX reference
# ----------------------------------------------------------------------------
def init_cnnblock2_params(key, image_channels, n_channels, level):
    params = {}
    cin0 = image_channels + n_channels
    k0, k1, key = jax.random.split(key, 3)
    std0 = (2.0 / (cin0 * 9)) ** 0.5
    params["w0"] = jax.random.normal(k0, (3, 3, cin0, n_channels), jnp.float32) * std0
    params["b0"] = jax.random.normal(k1, (n_channels,), jnp.float32) * 0.01

    params["mid"] = []
    std = (2.0 / (n_channels * 9)) ** 0.5
    for _ in range(level - 2):
        key, kw = jax.random.split(key)
        w = jax.random.normal(kw, (3, 3, n_channels, n_channels), jnp.float32) * std
        params["mid"].append({
            "w": w,
            "gamma": jnp.ones((n_channels,), jnp.float32),   # BatchNorm defaults
            "beta": jnp.zeros((n_channels,), jnp.float32),
        })
    return params


def cnnblock2_reference(params, x, x0, *, bn_eps=1e-4):
    def conv(inp, w, b):
        y = jax.lax.conv_general_dilated(
            inp, w, window_strides=(1, 1), padding="SAME",
            dimension_numbers=("NHWC", "HWIO", "NHWC"))
        if b is not None:
            y = y + b.reshape(1, 1, 1, -1)
        return y

    x1 = jnp.concatenate([x0, x], axis=-1)
    out = jnp.maximum(conv(x1, params["w0"], params["b0"]), 0.0)
    for layer in params["mid"]:
        out = conv(out, layer["w"], None)
        mean = jnp.mean(out, axis=(0, 1, 2), keepdims=True)
        var = jnp.mean((out - mean) ** 2, axis=(0, 1, 2), keepdims=True)
        out = (out - mean) * jax.lax.rsqrt(var + bn_eps)
        out = out * layer["gamma"].reshape(1, 1, 1, -1) + layer["beta"].reshape(1, 1, 1, -1)
        out = jnp.maximum(out, 0.0)
    return out


if __name__ == "__main__":
    # NHWC equivalents of the PyTorch NCHW inputs: x (2,8,16,16), x0 (2,4,16,16)
    N, H, W = 2, 16, 16
    image_channels, n_channels, level = 4, 8, 4

    key = jax.random.PRNGKey(0)
    kx, kx0, kp = jax.random.split(key, 3)
    x = jax.random.normal(kx, (N, H, W, n_channels), jnp.float32)
    x0 = jax.random.normal(kx0, (N, H, W, image_channels), jnp.float32)
    params = init_cnnblock2_params(kp, image_channels, n_channels, level)

    fwd = jax.jit(functools.partial(cnnblock2_pallas, bn_eps=1e-4))
    out = jax.block_until_ready(fwd(params, x, x0))

    ref = cnnblock2_reference(params, x, x0, bn_eps=1e-4)
    assert out.shape == (N, H, W, n_channels)
    err = float(jnp.max(jnp.abs(out - ref)))
    assert err < 5e-4, f"max abs error vs reference: {err}"
    print("KERNEL_OK")
</pallas_src>

<mosaic_0001>
module attributes {stable_mosaic.version = 11 : i64} {
  func.func @kernel(%arg0: memref<16x686xf32, #tpu.memory_space<vmem>>, %arg1: memref<1x648xf32, #tpu.memory_space<vmem>>, %arg2: memref<9x8x16xf32, #tpu.memory_space<vmem>>, %arg3: memref<8x1xf32, #tpu.memory_space<vmem>>, %arg4: memref<18x8x8xf32, #tpu.memory_space<vmem>>, %arg5: memref<2x8x1xf32, #tpu.memory_space<vmem>>, %arg6: memref<2x8x1xf32, #tpu.memory_space<vmem>>, %arg7: memref<8x648xf32, #tpu.memory_space<vmem>>, %arg8: memref<16x686xf32, #tpu.memory_space<vmem>>) attributes {dimension_semantics = [], scalar_prefetch = 0 : i64, scratch_operands = 1 : i64, tpu.core_type = #tpu.core_type<tc>} {
    %c0 = arith.constant 0 : index
    %c0_0 = arith.constant 0 : index
    %0 = vector.load %arg0[%c0, %c0_0] : memref<16x686xf32, #tpu.memory_space<vmem>>, vector<16x686xf32>
    %c0_1 = arith.constant 0 : index
    %c0_2 = arith.constant 0 : index
    %1 = vector.load %arg8[%c0_1, %c0_2] : memref<16x686xf32, #tpu.memory_space<vmem>>, vector<16x686xf32>
    tpu.vector_store %arg8[%c0_1, %c0_2], %0 {strides = array<i32>} : memref<16x686xf32, #tpu.memory_space<vmem>>, vector<16x686xf32>,
    %c0_3 = arith.constant 0 : index
    %c0_4 = arith.constant 0 : index
    %2 = vector.load %arg1[%c0_3, %c0_4] : memref<1x648xf32, #tpu.memory_space<vmem>>, vector<1x648xf32>
    %cst = arith.constant 0.000000e+00 : f32
    %3 = vector.broadcast %cst : f32 to vector<8x648xf32>
    %c0_5 = arith.constant 0 : index
    %c0_6 = arith.constant 0 : index
    %4 = vector.load %arg8[%c0_5, %c0_6] : memref<16x686xf32, #tpu.memory_space<vmem>>, vector<16x648xf32>
    %c0_7 = arith.constant 0 : index
    %c0_8 = arith.constant 0 : index
    %c0_9 = arith.constant 0 : index
    %5 = vector.load %arg2[%c0_7, %c0_8, %c0_9] : memref<9x8x16xf32, #tpu.memory_space<vmem>>, vector<1x8x16xf32>
    %6 = vector.shape_cast %5 : vector<1x8x16xf32> to vector<8x16xf32>
    %cst_10 = arith.constant dense<0.000000e+00> : vector<8x648xf32>
    %7 = tpu.matmul %6, %4, %cst_10 {dimension_numbers = #tpu.dot_dimension_numbers<[1], [0], [0], [1], [0, 0, 1, 1], [], []>} : vector<8x16xf32>, vector<16x648xf32>, vector<8x648xf32> -> vector<8x648xf32>
    %8 = arith.addf %3, %7 : vector<8x648xf32>
    %c0_11 = arith.constant 0 : index
    %c1 = arith.constant 1 : index
    %9 = vector.load %arg8[%c0_11, %c1] : memref<16x686xf32, #tpu.memory_space<vmem>>, vector<16x648xf32>
    %c1_12 = arith.constant 1 : index
    %c0_13 = arith.constant 0 : index
    %c0_14 = arith.constant 0 : index
    %10 = vector.load %arg2[%c1_12, %c0_13, %c0_14] : memref<9x8x16xf32, #tpu.memory_space<vmem>>, vector<1x8x16xf32>
    %11 = vector.shape_cast %10 : vector<1x8x16xf32> to vector<8x16xf32>
    %cst_15 = arith.constant dense<0.000000e+00> : vector<8x648xf32>
    %12 = tpu.matmul %11, %9, %cst_15 {dimension_numbers = #tpu.dot_dimension_numbers<[1], [0], [0], [1], [0, 0, 1, 1], [], []>} : vector<8x16xf32>, vector<16x648xf32>, vector<8x648xf32> -> vector<8x648xf32>
    %13 = arith.addf %8, %12 : vector<8x648xf32>
    %c0_16 = arith.constant 0 : index
    %c2 = arith.constant 2 : index
    %14 = vector.load %arg8[%c0_16, %c2] : memref<16x686xf32, #tpu.memory_space<vmem>>, vector<16x648xf32>
    %c2_17 = arith.constant 2 : index
    %c0_18 = arith.constant 0 : index
    %c0_19 = arith.constant 0 : index
    %15 = vector.load %arg2[%c2_17, %c0_18, %c0_19] : memref<9x8x16xf32, #tpu.memory_space<vmem>>, vector<1x8x16xf32>
    %16 = vector.shape_cast %15 : vector<1x8x16xf32> to vector<8x16xf32>
    %cst_20 = arith.constant dense<0.000000e+00> : vector<8x648xf32>
    %17 = tpu.matmul %16, %14, %cst_20 {dimension_numbers = #tpu.dot_dimension_numbers<[1], [0], [0], [1], [0, 0, 1, 1], [], []>} : vector<8x16xf32>, vector<16x648xf32>, vector<8x648xf32> -> vector<8x648xf32>
    %18 = arith.addf %13, %17 : vector<8x648xf32>
    %c0_21 = arith.constant 0 : index
    %c18 = arith.constant 18 : index
    %19 = vector.load %arg8[%c0_21, %c18] : memref<16x686xf32, #tpu.memory_space<vmem>>, vector<16x648xf32>
    %c3 = arith.constant 3 : index
    %c0_22 = arith.constant 0 : index
    %c0_23 = arith.constant 0 : index
    %20 = vector.load %arg2[%c3, %c0_22, %c0_23] : memref<9x8x16xf32, #tpu.memory_space<vmem>>, vector<1x8x16xf32>
    %21 = vector.shape_cast %20 : vector<1x8x16xf32> to vector<8x16xf32>
    %cst_24 = arith.constant dense<0.000000e+00> : vector<8x648xf32>
    %22 = tpu.matmul %21, %19, %cst_24 {dimension_numbers = #tpu.dot_dimension_numbers<[1], [0], [0], [1], [0, 0, 1, 1], [], []>} : vector<8x16xf32>, vector<16x648xf32>, vector<8x648xf32> -> vector<8x648xf32>
    %23 = arith.addf %18, %22 : vector<8x648xf32>
    %c0_25 = arith.constant 0 : index
    %c19 = arith.constant 19 : index
    %24 = vector.load %arg8[%c0_25, %c19] : memref<16x686xf32, #tpu.memory_space<vmem>>, vector<16x648xf32>
    %c4 = arith.constant 4 : index
    %c0_26 = arith.constant 0 : index
    %c0_27 = arith.constant 0 : index
    %25 = vector.load %arg2[%c4, %c0_26, %c0_27] : memref<9x8x16xf32, #tpu.memory_space<vmem>>, vector<1x8x16xf32>
    %26 = vector.shape_cast %25 : vector<1x8x16xf32> to vector<8x16xf32>
    %cst_28 = arith.constant dense<0.000000e+00> : vector<8x648xf32>
    %27 = tpu.matmul %26, %24, %cst_28 {dimension_numbers = #tpu.dot_dimension_numbers<[1], [0], [0], [1], [0, 0, 1, 1], [], []>} : vector<8x16xf32>, vector<16x648xf32>, vector<8x648xf32> -> vector<8x648xf32>
    %28 = arith.addf %23, %27 : vector<8x648xf32>
    %c0_29 = arith.constant 0 : index
    %c20 = arith.constant 20 : index
    %29 = vector.load %arg8[%c0_29, %c20] : memref<16x686xf32, #tpu.memory_space<vmem>>, vector<16x648xf32>
    %c5 = arith.constant 5 : index
    %c0_30 = arith.constant 0 : index
    %c0_31 = arith.constant 0 : index
    %30 = vector.load %arg2[%c5, %c0_30, %c0_31] : memref<9x8x16xf32, #tpu.memory_space<vmem>>, vector<1x8x16xf32>
    %31 = vector.shape_cast %30 : vector<1x8x16xf32> to vector<8x16xf32>
    %cst_32 = arith.constant dense<0.000000e+00> : vector<8x648xf32>
    %32 = tpu.matmul %31, %29, %cst_32 {dimension_numbers = #tpu.dot_dimension_numbers<[1], [0], [0], [1], [0, 0, 1, 1], [], []>} : vector<8x16xf32>, vector<16x648xf32>, vector<8x648xf32> -> vector<8x648xf32>
    %33 = arith.addf %28, %32 : vector<8x648xf32>
    %c0_33 = arith.constant 0 : index
    %c36 = arith.constant 36 : index
    %34 = vector.load %arg8[%c0_33, %c36] : memref<16x686xf32, #tpu.memory_space<vmem>>, vector<16x648xf32>
    %c6 = arith.constant 6 : index
    %c0_34 = arith.constant 0 : index
    %c0_35 = arith.constant 0 : index
    %35 = vector.load %arg2[%c6, %c0_34, %c0_35] : memref<9x8x16xf32, #tpu.memory_space<vmem>>, vector<1x8x16xf32>
    %36 = vector.shape_cast %35 : vector<1x8x16xf32> to vector<8x16xf32>
    %cst_36 = arith.constant dense<0.000000e+00> : vector<8x648xf32>
    %37 = tpu.matmul %36, %34, %cst_36 {dimension_numbers = #tpu.dot_dimension_numbers<[1], [0], [0], [1], [0, 0, 1, 1], [], []>} : vector<8x16xf32>, vector<16x648xf32>, vector<8x648xf32> -> vector<8x648xf32>
    %38 = arith.addf %33, %37 : vector<8x648xf32>
    %c0_37 = arith.constant 0 : index
    %c37 = arith.constant 37 : index
    %39 = vector.load %arg8[%c0_37, %c37] : memref<16x686xf32, #tpu.memory_space<vmem>>, vector<16x648xf32>
    %c7 = arith.constant 7 : index
    %c0_38 = arith.constant 0 : index
    %c0_39 = arith.constant 0 : index
    %40 = vector.load %arg2[%c7, %c0_38, %c0_39] : memref<9x8x16xf32, #tpu.memory_space<vmem>>, vector<1x8x16xf32>
    %41 = vector.shape_cast %40 : vector<1x8x16xf32> to vector<8x16xf32>
    %cst_40 = arith.constant dense<0.000000e+00> : vector<8x648xf32>
    %42 = tpu.matmul %41, %39, %cst_40 {dimension_numbers = #tpu.dot_dimension_numbers<[1], [0], [0], [1], [0, 0, 1, 1], [], []>} : vector<8x16xf32>, vector<16x648xf32>, vector<8x648xf32> -> vector<8x648xf32>
    %43 = arith.addf %38, %42 : vector<8x648xf32>
    %c0_41 = arith.constant 0 : index
    %c38 = arith.constant 38 : index
    %44 = vector.load %arg8[%c0_41, %c38] : memref<16x686xf32, #tpu.memory_space<vmem>>, vector<16x648xf32>
    %c8 = arith.constant 8 : index
    %c0_42 = arith.constant 0 : index
    %c0_43 = arith.constant 0 : index
    %45 = vector.load %arg2[%c8, %c0_42, %c0_43] : memref<9x8x16xf32, #tpu.memory_space<vmem>>, vector<1x8x16xf32>
    %46 = vector.shape_cast %45 : vector<1x8x16xf32> to vector<8x16xf32>
    %cst_44 = arith.constant dense<0.000000e+00> : vector<8x648xf32>
    %47 = tpu.matmul %46, %44, %cst_44 {dimension_numbers = #tpu.dot_dimension_numbers<[1], [0], [0], [1], [0, 0, 1, 1], [], []>} : vector<8x16xf32>, vector<16x648xf32>, vector<8x648xf32> -> vector<8x648xf32>
    %48 = arith.addf %43, %47 : vector<8x648xf32>
    %c0_45 = arith.constant 0 : index
    %c0_46 = arith.constant 0 : index
    %49 = vector.load %arg3[%c0_45, %c0_46] : memref<8x1xf32, #tpu.memory_space<vmem>>, vector<8x1xf32>
    %50 = vector.broadcast %49 : vector<8x1xf32> to vector<8x648xf32>
    %51 = arith.addf %48, %50 : vector<8x648xf32>
    %cst_47 = arith.constant 0.000000e+00 : f32
    %52 = vector.broadcast %cst_47 : f32 to vector<8x648xf32>
    %53 = arith.maximumf %51, %52 : vector<8x648xf32>
    %54 = vector.broadcast %2 : vector<1x648xf32> to vector<8x648xf32>
    %55 = arith.mulf %53, %54 : vector<8x648xf32>
    %c0_48 = arith.constant 0 : index
    %c19_49 = arith.constant 19 : index
    %56 = vector.load %arg8[%c0_48, %c19_49] : memref<16x686xf32, #tpu.memory_space<vmem>>, vector<8x648xf32>
    tpu.vector_store %arg8[%c0_48, %c19_49], %55 {strides = array<i32>} : memref<16x686xf32, #tpu.memory_space<vmem>>, vector<8x648xf32>,
    %cst_50 = arith.constant 0.000000e+00 : f32
    %57 = vector.broadcast %cst_50 : f32 to vector<8x648xf32>
    %c0_51 = arith.constant 0 : index
    %c0_52 = arith.constant 0 : index
    %58 = vector.load %arg8[%c0_51, %c0_52] : memref<16x686xf32, #tpu.memory_space<vmem>>, vector<8x648xf32>
    %c0_53 = arith.constant 0 : index
    %c0_54 = arith.constant 0 : index
    %c0_55 = arith.constant 0 : index
    %59 = vector.load %arg4[%c0_53, %c0_54, %c0_55] : memref<18x8x8xf32, #tpu.memory_space<vmem>>, vector<1x8x8xf32>
    %60 = vector.shape_cast %59 : vector<1x8x8xf32> to vector<8x8xf32>
    %cst_56 = arith.constant dense<0.000000e+00> : vector<8x648xf32>
    %61 = tpu.matmul %60, %58, %cst_56 {dimension_numbers = #tpu.dot_dimension_numbers<[1], [0], [0], [1], [0, 0, 1, 1], [], []>} : vector<8x8xf32>, vector<8x648xf32>, vector<8x648xf32> -> vector<8x648xf32>
    %62 = arith.addf %57, %61 : vector<8x648xf32>
    %c0_57 = arith.constant 0 : index
    %c1_58 = arith.constant 1 : index
    %63 = vector.load %arg8[%c0_57, %c1_58] : memref<16x686xf32, #tpu.memory_space<vmem>>, vector<8x648xf32>
    %c1_59 = arith.constant 1 : index
    %c0_60 = arith.constant 0 : index
    %c0_61 = arith.constant 0 : index
    %64 = vector.load %arg4[%c1_59, %c0_60, %c0_61] : memref<18x8x8xf32, #tpu.memory_space<vmem>>, vector<1x8x8xf32>
    %65 = vector.shape_cast %64 : vector<1x8x8xf32> to vector<8x8xf32>
    %cst_62 = arith.constant dense<0.000000e+00> : vector<8x648xf32>
    %66 = tpu.matmul %65, %63, %cst_62 {dimension_numbers = #tpu.dot_dimension_numbers<[1], [0], [0], [1], [0, 0, 1, 1], [], []>} : vector<8x8xf32>, vector<8x648xf32>, vector<8x648xf32> -> vector<8x648xf32>
    %67 = arith.addf %62, %66 : vector<8x648xf32>
    %c0_63 = arith.constant 0 : index
    %c2_64 = arith.constant 2 : index
    %68 = vector.load %arg8[%c0_63, %c2_64] : memref<16x686xf32, #tpu.memory_space<vmem>>, vector<8x648xf32>
    %c2_65 = arith.constant 2 : index
    %c0_66 = arith.constant 0 : index
    %c0_67 = arith.constant 0 : index
    %69 = vector.load %arg4[%c2_65, %c0_66, %c0_67] : memref<18x8x8xf32, #tpu.memory_space<vmem>>, vector<1x8x8xf32>
    %70 = vector.shape_cast %69 : vector<1x8x8xf32> to vector<8x8xf32>
    %cst_68 = arith.constant dense<0.000000e+00> : vector<8x648xf32>
    %71 = tpu.matmul %70, %68, %cst_68 {dimension_numbers = #tpu.dot_dimension_numbers<[1], [0], [0], [1], [0, 0, 1, 1], [], []>} : vector<8x8xf32>, vector<8x648xf32>, vector<8x648xf32> -> vector<8x648xf32>
    %72 = arith.addf %67, %71 : vector<8x648xf32>
    %c0_69 = arith.constant 0 : index
    %c18_70 = arith.constant 18 : index
    %73 = vector.load %arg8[%c0_69, %c18_70] : memref<16x686xf32, #tpu.memory_space<vmem>>, vector<8x648xf32>
    %c3_71 = arith.constant 3 : index
    %c0_72 = arith.constant 0 : index
    %c0_73 = arith.constant 0 : index
    %74 = vector.load %arg4[%c3_71, %c0_72, %c0_73] : memref<18x8x8xf32, #tpu.memory_space<vmem>>, vector<1x8x8xf32>
    %75 = vector.shape_cast %74 : vector<1x8x8xf32> to vector<8x8xf32>
    %cst_74 = arith.constant dense<0.000000e+00> : vector<8x648xf32>
    %76 = tpu.matmul %75, %73, %cst_74 {dimension_numbers = #tpu.dot_dimension_numbers<[1], [0], [0], [1], [0, 0, 1, 1], [], []>} : vector<8x8xf32>, vector<8x648xf32>, vector<8x648xf32> -> vector<8x648xf32>
    %77 = arith.addf %72, %76 : vector<8x648xf32>
    %c0_75 = arith.constant 0 : index
    %c19_76 = arith.constant 19 : index
    %78 = vector.load %arg8[%c0_75, %c19_76] : memref<16x686xf32, #tpu.memory_space<vmem>>, vector<8x648xf32>
    %c4_77 = arith.constant 4 : index
    %c0_78 = arith.constant 0 : index
    %c0_79 = arith.constant 0 : index
    %79 = vector.load %arg4[%c4_77, %c0_78, %c0_79] : memref<18x8x8xf32, #tpu.memory_space<vmem>>, vector<1x8x8xf32>
    %80 = vector.shape_cast %79 : vector<1x8x8xf32> to vector<8x8xf32>
    %cst_80 = arith.constant dense<0.000000e+00> : vector<8x648xf32>
    %81 = tpu.matmul %80, %78, %cst_80 {dimension_numbers = #tpu.dot_dimension_numbers<[1], [0], [0], [1], [0, 0, 1, 1], [], []>} : vector<8x8xf32>, vector<8x648xf32>, vector<8x648xf32> -> vector<8x648xf32>
    %82 = arith.addf %77, %81 : vector<8x648xf32>
    %c0_81 = arith.constant 0 : index
    %c20_82 = arith.constant 20 : index
    %83 = vector.load %arg8[%c0_81, %c20_82] : memref<16x686xf32, #tpu.memory_space<vmem>>, vector<8x648xf32>
    %c5_83 = arith.constant 5 : index
    %c0_84 = arith.constant 0 : index
    %c0_85 = arith.constant 0 : index
    %84 = vector.load %arg4[%c5_83, %c0_84, %c0_85] : memref<18x8x8xf32, #tpu.memory_space<vmem>>, vector<1x8x8xf32>
    %85 = vector.shape_cast %84 : vector<1x8x8xf32> to vector<8x8xf32>
    %cst_86 = arith.constant dense<0.000000e+00> : vector<8x648xf32>
    %86 = tpu.matmul %85, %83, %cst_86 {dimension_numbers = #tpu.dot_dimension_numbers<[1], [0], [0], [1], [0, 0, 1, 1], [], []>} : vector<8x8xf32>, vector<8x648xf32>, vector<8x648xf32> -> vector<8x648xf32>
    %87 = arith.addf %82, %86 : vector<8x648xf32>
    %c0_87 = arith.constant 0 : index
    %c36_88 = arith.constant 36 : index
    %88 = vector.load %arg8[%c0_87, %c36_88] : memref<16x686xf32, #tpu.memory_space<vmem>>, vector<8x648xf32>
    %c6_89 = arith.constant 6 : index
    %c0_90 = arith.constant 0 : index
    %c0_91 = arith.constant 0 : index
    %89 = vector.load %arg4[%c6_89, %c0_90, %c0_91] : memref<18x8x8xf32, #tpu.memory_space<vmem>>, vector<1x8x8xf32>
    %90 = vector.shape_cast %89 : vector<1x8x8xf32> to vector<8x8xf32>
    %cst_92 = arith.constant dense<0.000000e+00> : vector<8x648xf32>
    %91 = tpu.matmul %90, %88, %cst_92 {dimension_numbers = #tpu.dot_dimension_numbers<[1], [0], [0], [1], [0, 0, 1, 1], [], []>} : vector<8x8xf32>, vector<8x648xf32>, vector<8x648xf32> -> vector<8x648xf32>
    %92 = arith.addf %87, %91 : vector<8x648xf32>
    %c0_93 = arith.constant 0 : index
    %c37_94 = arith.constant 37 : index
    %93 = vector.load %arg8[%c0_93, %c37_94] : memref<16x686xf32, #tpu.memory_space<vmem>>, vector<8x648xf32>
    %c7_95 = arith.constant 7 : index
    %c0_96 = arith.constant 0 : index
    %c0_97 = arith.constant 0 : index
    %94 = vector.load %arg4[%c7_95, %c0_96, %c0_97] : memref<18x8x8xf32, #tpu.memory_space<vmem>>, vector<1x8x8xf32>
    %95 = vector.shape_cast %94 : vector<1x8x8xf32> to vector<8x8xf32>
    %cst_98 = arith.constant dense<0.000000e+00> : vector<8x648xf32>
    %96 = tpu.matmul %95, %93, %cst_98 {dimension_numbers = #tpu.dot_dimension_numbers<[1], [0], [0], [1], [0, 0, 1, 1], [], []>} : vector<8x8xf32>, vector<8x648xf32>, vector<8x648xf32> -> vector<8x648xf32>
    %97 = arith.addf %92, %96 : vector<8x648xf32>
    %c0_99 = arith.constant 0 : index
    %c38_100 = arith.constant 38 : index
    %98 = vector.load %arg8[%c0_99, %c38_100] : memref<16x686xf32, #tpu.memory_space<vmem>>, vector<8x648xf32>
    %c8_101 = arith.constant 8 : index
    %c0_102 = arith.constant 0 : index
    %c0_103 = arith.constant 0 : index
    %99 = vector.load %arg4[%c8_101, %c0_102, %c0_103] : memref<18x8x8xf32, #tpu.memory_space<vmem>>, vector<1x8x8xf32>
    %100 = vector.shape_cast %99 : vector<1x8x8xf32> to vector<8x8xf32>
    %cst_104 = arith.constant dense<0.000000e+00> : vector<8x648xf32>
    %101 = tpu.matmul %100, %98, %cst_104 {dimension_numbers = #tpu.dot_dimension_numbers<[1], [0], [0], [1], [0, 0, 1, 1], [], []>} : vector<8x8xf32>, vector<8x648xf32>, vector<8x648xf32> -> vector<8x648xf32>
    %102 = arith.addf %97, %101 : vector<8x648xf32>
    %103 = vector.broadcast %2 : vector<1x648xf32> to vector<8x648xf32>
    %104 = arith.mulf %102, %103 : vector<8x648xf32>
    %cst_105 = arith.constant dense<0.000000e+00> : vector<8xf32>
    %105 = vector.multi_reduction <add>, %104, %cst_105 [1] : vector<8x648xf32> to vector<8xf32>
    %106 = vector.shape_cast %105 : vector<8xf32> to vector<8x1xf32>
    %107 = arith.mulf %104, %102 : vector<8x648xf32>
    %cst_106 = arith.constant dense<0.000000e+00> : vector<8xf32>
    %108 = vector.multi_reduction <add>, %107, %cst_106 [1] : vector<8x648xf32> to vector<8xf32>
    %109 = vector.shape_cast %108 : vector<8xf32> to vector<8x1xf32>
    %cst_107 = arith.constant 0.001953125 : f32
    %110 = vector.broadcast %cst_107 : f32 to vector<8x1xf32>
    %111 = arith.mulf %106, %110 : vector<8x1xf32>
    %cst_108 = arith.constant 0.001953125 : f32
    %112 = vector.broadcast %cst_108 : f32 to vector<8x1xf32>
    %113 = arith.mulf %109, %112 : vector<8x1xf32>
    %114 = arith.mulf %111, %111 : vector<8x1xf32>
    %115 = arith.subf %113, %114 : vector<8x1xf32>
    %cst_109 = arith.constant 9.99999974E-5 : f32
    %116 = vector.broadcast %cst_109 : f32 to vector<8x1xf32>
    %117 = arith.addf %115, %116 : vector<8x1xf32>
    %118 = math.rsqrt %117 : vector<8x1xf32>
    %119 = vector.broadcast %111 : vector<8x1xf32> to vector<8x648xf32>
    %120 = arith.subf %102, %119 : vector<8x648xf32>
    %c0_110 = arith.constant 0 : index
    %c0_111 = arith.constant 0 : index
    %c0_112 = arith.constant 0 : index
    %121 = vector.load %arg5[%c0_110, %c0_111, %c0_112] : memref<2x8x1xf32, #tpu.memory_space<vmem>>, vector<1x8x1xf32>
    %122 = vector.shape_cast %121 : vector<1x8x1xf32> to vector<8x1xf32>
    %123 = arith.mulf %118, %122 : vector<8x1xf32>
    %124 = vector.broadcast %123 : vector<8x1xf32> to vector<8x648xf32>
    %125 = arith.mulf %120, %124 : vector<8x648xf32>
    %c0_113 = arith.constant 0 : index
    %c0_114 = arith.constant 0 : index
    %c0_115 = arith.constant 0 : index
    %126 = vector.load %arg6[%c0_113, %c0_114, %c0_115] : memref<2x8x1xf32, #tpu.memory_space<vmem>>, vector<1x8x1xf32>
    %127 = vector.shape_cast %126 : vector<1x8x1xf32> to vector<8x1xf32>
    %128 = vector.broadcast %127 : vector<8x1xf32> to vector<8x648xf32>
    %129 = arith.addf %125, %128 : vector<8x648xf32>
    %cst_116 = arith.constant 0.000000e+00 : f32
    %130 = vector.broadcast %cst_116 : f32 to vector<8x648xf32>
    %131 = arith.maximumf %129, %130 : vector<8x648xf32>
    %132 = vector.broadcast %2 : vector<1x648xf32> to vector<8x648xf32>
    %133 = arith.mulf %131, %132 : vector<8x648xf32>
    %c0_117 = arith.constant 0 : index
    %c19_118 = arith.constant 19 : index
    %134 = vector.load %arg8[%c0_117, %c19_118] : memref<16x686xf32, #tpu.memory_space<vmem>>, vector<8x648xf32>
    tpu.vector_store %arg8[%c0_117, %c19_118], %133 {strides = array<i32>} : memref<16x686xf32, #tpu.memory_space<vmem>>, vector<8x648xf32>,
    %cst_119 = arith.constant 0.000000e+00 : f32
    %135 = vector.broadcast %cst_119 : f32 to vector<8x648xf32>
    %c0_120 = arith.constant 0 : index
    %c0_121 = arith.constant 0 : index
    %136 = vector.load %arg8[%c0_120, %c0_121] : memref<16x686xf32, #tpu.memory_space<vmem>>, vector<8x648xf32>
    %c9 = arith.constant 9 : index
    %c0_122 = arith.constant 0 : index
    %c0_123 = arith.constant 0 : index
    %137 = vector.load %arg4[%c9, %c0_122, %c0_123] : memref<18x8x8xf32, #tpu.memory_space<vmem>>, vector<1x8x8xf32>
    %138 = vector.shape_cast %137 : vector<1x8x8xf32> to vector<8x8xf32>
    %cst_124 = arith.constant dense<0.000000e+00> : vector<8x648xf32>
    %139 = tpu.matmul %138, %136, %cst_124 {dimension_numbers = #tpu.dot_dimension_numbers<[1], [0], [0], [1], [0, 0, 1, 1], [], []>} : vector<8x8xf32>, vector<8x648xf32>, vector<8x648xf32> -> vector<8x648xf32>
    %140 = arith.addf %135, %139 : vector<8x648xf32>
    %c0_125 = arith.constant 0 : index
    %c1_126 = arith.constant 1 : index
    %141 = vector.load %arg8[%c0_125, %c1_126] : memref<16x686xf32, #tpu.memory_space<vmem>>, vector<8x648xf32>
    %c10 = arith.constant 10 : index
    %c0_127 = arith.constant 0 : index
    %c0_128 = arith.constant 0 : index
    %142 = vector.load %arg4[%c10, %c0_127, %c0_128] : memref<18x8x8xf32, #tpu.memory_space<vmem>>, vector<1x8x8xf32>
    %143 = vector.shape_cast %142 : vector<1x8x8xf32> to vector<8x8xf32>
    %cst_129 = arith.constant dense<0.000000e+00> : vector<8x648xf32>
    %144 = tpu.matmul %143, %141, %cst_129 {dimension_numbers = #tpu.dot_dimension_numbers<[1], [0], [0], [1], [0, 0, 1, 1], [], []>} : vector<8x8xf32>, vector<8x648xf32>, vector<8x648xf32> -> vector<8x648xf32>
    %145 = arith.addf %140, %144 : vector<8x648xf32>
    %c0_130 = arith.constant 0 : index
    %c2_131 = arith.constant 2 : index
    %146 = vector.load %arg8[%c0_130, %c2_131] : memref<16x686xf32, #tpu.memory_space<vmem>>, vector<8x648xf32>
    %c11 = arith.constant 11 : index
    %c0_132 = arith.constant 0 : index
    %c0_133 = arith.constant 0 : index
    %147 = vector.load %arg4[%c11, %c0_132, %c0_133] : memref<18x8x8xf32, #tpu.memory_space<vmem>>, vector<1x8x8xf32>
    %148 = vector.shape_cast %147 : vector<1x8x8xf32> to vector<8x8xf32>
    %cst_134 = arith.constant dense<0.000000e+00> : vector<8x648xf32>
    %149 = tpu.matmul %148, %146, %cst_134 {dimension_numbers = #tpu.dot_dimension_numbers<[1], [0], [0], [1], [0, 0, 1, 1], [], []>} : vector<8x8xf32>, vector<8x648xf32>, vector<8x648xf32> -> vector<8x648xf32>
    %150 = arith.addf %145, %149 : vector<8x648xf32>
    %c0_135 = arith.constant 0 : index
    %c18_136 = arith.constant 18 : index
    %151 = vector.load %arg8[%c0_135, %c18_136] : memref<16x686xf32, #tpu.memory_space<vmem>>, vector<8x648xf32>
    %c12 = arith.constant 12 : index
    %c0_137 = arith.constant 0 : index
    %c0_138 = arith.constant 0 : index
    %152 = vector.load %arg4[%c12, %c0_137, %c0_138] : memref<18x8x8xf32, #tpu.memory_space<vmem>>, vector<1x8x8xf32>
    %153 = vector.shape_cast %152 : vector<1x8x8xf32> to vector<8x8xf32>
    %cst_139 = arith.constant dense<0.000000e+00> : vector<8x648xf32>
    %154 = tpu.matmul %153, %151, %cst_139 {dimension_numbers = #tpu.dot_dimension_numbers<[1], [0], [0], [1], [0, 0, 1, 1], [], []>} : vector<8x8xf32>, vector<8x648xf32>, vector<8x648xf32> -> vector<8x648xf32>
    %155 = arith.addf %150, %154 : vector<8x648xf32>
    %c0_140 = arith.constant 0 : index
    %c19_141 = arith.constant 19 : index
    %156 = vector.load %arg8[%c0_140, %c19_141] : memref<16x686xf32, #tpu.memory_space<vmem>>, vector<8x648xf32>
    %c13 = arith.constant 13 : index
    %c0_142 = arith.constant 0 : index
    %c0_143 = arith.constant 0 : index
    %157 = vector.load %arg4[%c13, %c0_142, %c0_143] : memref<18x8x8xf32, #tpu.memory_space<vmem>>, vector<1x8x8xf32>
    %158 = vector.shape_cast %157 : vector<1x8x8xf32> to vector<8x8xf32>
    %cst_144 = arith.constant dense<0.000000e+00> : vector<8x648xf32>
    %159 = tpu.matmul %158, %156, %cst_144 {dimension_numbers = #tpu.dot_dimension_numbers<[1], [0], [0], [1], [0, 0, 1, 1], [], []>} : vector<8x8xf32>, vector<8x648xf32>, vector<8x648xf32> -> vector<8x648xf32>
    %160 = arith.addf %155, %159 : vector<8x648xf32>
    %c0_145 = arith.constant 0 : index
    %c20_146 = arith.constant 20 : index
    %161 = vector.load %arg8[%c0_145, %c20_146] : memref<16x686xf32, #tpu.memory_space<vmem>>, vector<8x648xf32>
    %c14 = arith.constant 14 : index
    %c0_147 = arith.constant 0 : index
    %c0_148 = arith.constant 0 : index
    %162 = vector.load %arg4[%c14, %c0_147, %c0_148] : memref<18x8x8xf32, #tpu.memory_space<vmem>>, vector<1x8x8xf32>
    %163 = vector.shape_cast %162 : vector<1x8x8xf32> to vector<8x8xf32>
    %cst_149 = arith.constant dense<0.000000e+00> : vector<8x648xf32>
    %164 = tpu.matmul %163, %161, %cst_149 {dimension_numbers = #tpu.dot_dimension_numbers<[1], [0], [0], [1], [0, 0, 1, 1], [], []>} : vector<8x8xf32>, vector<8x648xf32>, vector<8x648xf32> -> vector<8x648xf32>
    %165 = arith.addf %160, %164 : vector<8x648xf32>
    %c0_150 = arith.constant 0 : index
    %c36_151 = arith.constant 36 : index
    %166 = vector.load %arg8[%c0_150, %c36_151] : memref<16x686xf32, #tpu.memory_space<vmem>>, vector<8x648xf32>
    %c15 = arith.constant 15 : index
    %c0_152 = arith.constant 0 : index
    %c0_153 = arith.constant 0 : index
    %167 = vector.load %arg4[%c15, %c0_152, %c0_153] : memref<18x8x8xf32, #tpu.memory_space<vmem>>, vector<1x8x8xf32>
    %168 = vector.shape_cast %167 : vector<1x8x8xf32> to vector<8x8xf32>
    %cst_154 = arith.constant dense<0.000000e+00> : vector<8x648xf32>
    %169 = tpu.matmul %168, %166, %cst_154 {dimension_numbers = #tpu.dot_dimension_numbers<[1], [0], [0], [1], [0, 0, 1, 1], [], []>} : vector<8x8xf32>, vector<8x648xf32>, vector<8x648xf32> -> vector<8x648xf32>
    %170 = arith.addf %165, %169 : vector<8x648xf32>
    %c0_155 = arith.constant 0 : index
    %c37_156 = arith.constant 37 : index
    %171 = vector.load %arg8[%c0_155, %c37_156] : memref<16x686xf32, #tpu.memory_space<vmem>>, vector<8x648xf32>
    %c16 = arith.constant 16 : index
    %c0_157 = arith.constant 0 : index
    %c0_158 = arith.constant 0 : index
    %172 = vector.load %arg4[%c16, %c0_157, %c0_158] : memref<18x8x8xf32, #tpu.memory_space<vmem>>, vector<1x8x8xf32>
    %173 = vector.shape_cast %172 : vector<1x8x8xf32> to vector<8x8xf32>
    %cst_159 = arith.constant dense<0.000000e+00> : vector<8x648xf32>
    %174 = tpu.matmul %173, %171, %cst_159 {dimension_numbers = #tpu.dot_dimension_numbers<[1], [0], [0], [1], [0, 0, 1, 1], [], []>} : vector<8x8xf32>, vector<8x648xf32>, vector<8x648xf32> -> vector<8x648xf32>
    %175 = arith.addf %170, %174 : vector<8x648xf32>
    %c0_160 = arith.constant 0 : index
    %c38_161 = arith.constant 38 : index
    %176 = vector.load %arg8[%c0_160, %c38_161] : memref<16x686xf32, #tpu.memory_space<vmem>>, vector<8x648xf32>
    %c17 = arith.constant 17 : index
    %c0_162 = arith.constant 0 : index
    %c0_163 = arith.constant 0 : index
    %177 = vector.load %arg4[%c17, %c0_162, %c0_163] : memref<18x8x8xf32, #tpu.memory_space<vmem>>, vector<1x8x8xf32>
    %178 = vector.shape_cast %177 : vector<1x8x8xf32> to vector<8x8xf32>
    %cst_164 = arith.constant dense<0.000000e+00> : vector<8x648xf32>
    %179 = tpu.matmul %178, %176, %cst_164 {dimension_numbers = #tpu.dot_dimension_numbers<[1], [0], [0], [1], [0, 0, 1, 1], [], []>} : vector<8x8xf32>, vector<8x648xf32>, vector<8x648xf32> -> vector<8x648xf32>
    %180 = arith.addf %175, %179 : vector<8x648xf32>
    %181 = vector.broadcast %2 : vector<1x648xf32> to vector<8x648xf32>
    %182 = arith.mulf %180, %181 : vector<8x648xf32>
    %cst_165 = arith.constant dense<0.000000e+00> : vector<8xf32>
    %183 = vector.multi_reduction <add>, %182, %cst_165 [1] : vector<8x648xf32> to vector<8xf32>
    %184 = vector.shape_cast %183 : vector<8xf32> to vector<8x1xf32>
    %185 = arith.mulf %182, %180 : vector<8x648xf32>
    %cst_166 = arith.constant dense<0.000000e+00> : vector<8xf32>
    %186 = vector.multi_reduction <add>, %185, %cst_166 [1] : vector<8x648xf32> to vector<8xf32>
    %187 = vector.shape_cast %186 : vector<8xf32> to vector<8x1xf32>
    %cst_167 = arith.constant 0.001953125 : f32
    %188 = vector.broadcast %cst_167 : f32 to vector<8x1xf32>
    %189 = arith.mulf %184, %188 : vector<8x1xf32>
    %cst_168 = arith.constant 0.001953125 : f32
    %190 = vector.broadcast %cst_168 : f32 to vector<8x1xf32>
    %191 = arith.mulf %187, %190 : vector<8x1xf32>
    %192 = arith.mulf %189, %189 : vector<8x1xf32>
    %193 = arith.subf %191, %192 : vector<8x1xf32>
    %cst_169 = arith.constant 9.99999974E-5 : f32
    %194 = vector.broadcast %cst_169 : f32 to vector<8x1xf32>
    %195 = arith.addf %193, %194 : vector<8x1xf32>
    %196 = math.rsqrt %195 : vector<8x1xf32>
    %197 = vector.broadcast %189 : vector<8x1xf32> to vector<8x648xf32>
    %198 = arith.subf %180, %197 : vector<8x648xf32>
    %c1_170 = arith.constant 1 : index
    %c0_171 = arith.constant 0 : index
    %c0_172 = arith.constant 0 : index
    %199 = vector.load %arg5[%c1_170, %c0_171, %c0_172] : memref<2x8x1xf32, #tpu.memory_space<vmem>>, vector<1x8x1xf32>
    %200 = vector.shape_cast %199 : vector<1x8x1xf32> to vector<8x1xf32>
    %201 = arith.mulf %196, %200 : vector<8x1xf32>
    %202 = vector.broadcast %201 : vector<8x1xf32> to vector<8x648xf32>
    %203 = arith.mulf %198, %202 : vector<8x648xf32>
    %c1_173 = arith.constant 1 : index
    %c0_174 = arith.constant 0 : index
    %c0_175 = arith.constant 0 : index
    %204 = vector.load %arg6[%c1_173, %c0_174, %c0_175] : memref<2x8x1xf32, #tpu.memory_space<vmem>>, vector<1x8x1xf32>
    %205 = vector.shape_cast %204 : vector<1x8x1xf32> to vector<8x1xf32>
    %206 = vector.broadcast %205 : vector<8x1xf32> to vector<8x648xf32>
    %207 = arith.addf %203, %206 : vector<8x648xf32>
    %cst_176 = arith.constant 0.000000e+00 : f32
    %208 = vector.broadcast %cst_176 : f32 to vector<8x648xf32>
    %209 = arith.maximumf %207, %208 : vector<8x648xf32>
    %210 = vector.broadcast %2 : vector<1x648xf32> to vector<8x648xf32>
    %211 = arith.mulf %209, %210 : vector<8x648xf32>
    %c0_177 = arith.constant 0 : index
    %c0_178 = arith.constant 0 : index
    %212 = vector.load %arg7[%c0_177, %c0_178] : memref<8x648xf32, #tpu.memory_space<vmem>>, vector<8x648xf32>
    tpu.vector_store %arg7[%c0_177, %c0_178], %211 {strides = array<i32>} : memref<8x648xf32, #tpu.memory_space<vmem>>, vector<8x648xf32>,
    return
  }
}

</mosaic_0001>

<bundles_post_ra>
// kernel: cnnblock2_pallas.1
= control target key start
LH: loop header
LB: loop body
LE: loop exit
PB: predicated region body
PF: predicated region fallthrough
CT: control target
= control target key end

     0   :  { %s7275_s30 = smov 127   ;;  %vm43_vm0 = vcmask 375808   ;;  %v7276_v10 = vmov 0.0   ;;  %s7277_s26 = smov 126   ;;  %vm103_vm1 = vcmask 1039360   ;;  %vm126_vm2 = vcmask 130048   ;;  %s8456_s0 = inlined_call_operand.vmem [shape: f32[16,686], index: 0, kind: input, shape index: {}]   ;;  %s8457_s2 = inlined_call_operand.vmem [shape: f32[9,8,16], index: 2, kind: input, shape index: {}]   ;;  %s8458_s3 = inlined_call_operand.vmem [shape: f32[8,1], index: 3, kind: input, shape index: {}]   ;;  %s8459_s1 = inlined_call_operand.vmem [shape: f32[1,648], index: 1, kind: input, shape index: {}]   ;;  %s8460_s4 = inlined_call_operand.vmem [shape: f32[18,8,8], index: 4, kind: input, shape index: {}]   ;;  %s8461_s6 = inlined_call_operand.vmem [shape: f32[2,8,1], index: 6, kind: input, shape index: {}]   ;;  %s8462_s5 = inlined_call_operand.vmem [shape: f32[2,8,1], index: 5, kind: input, shape index: {}]   ;;  %s8463_s7 = inlined_call_operand.vmem [shape: f32[8,648], index: 7, kind: output, shape index: {}]  }
   0x1   :  { %v7329_v0 = vld [vmem:[%s8456_s0 + $0x38] sm:$0xff]  ;;  %v7334_v1 = vld [vmem:[%s8456_s0 + $0x30] sm:$0xff]  ;;  %v7339_v2 = vld [vmem:[%s8456_s0 + $0x40] sm:$0xff]  ;;  %194 = vmatprep.mubr.f32.mxu0 %v7276_v10  ;;  %265 = vmatprep.mubr.f32.mxu1 %v7276_v10  ;;  %s7279_s27 = smov 109   ;;  %s7280_s28 = smov 108   ;;  %vm585_vm3 = vcmask 1031168  }
   0x2   :  { %93 = vrot.lane.b32.xlu0 %v7329_v0, %s7275_s30  ;;  %91 = vrot.lane.b32.xlu1 %v7334_v1, %s7275_s30  ;;  %v7348_v3 = vld [vmem:[%s8456_s0 + $0x8] sm:$0xff]  ;;  %v7358_v5 = vld [vmem:[%s8456_s0 + $0x50] sm:$0xff]  ;;  %s7281_s29 = smov 92   ;;  %s7282_s12 = smov 91   ;;  %vm856_vm4 = vcmask 900096   ;;  %vm1127_vm5 = vcmask 891904  }
   0x3   :  { %v7353_v4 = vld [vmem:[%s8456_s0 + $0x48] sm:$0xff]  ;;  %v7363_v6 = vld [vmem:[%s8456_s0] sm:$0xff]  ;;  %v37_v8 = vld [vmem:[%s8456_s0 + $0x58] sm:$0xff]  ;;  %s7283_s15 = smov 90   ;;  %vm1398_vm6 = vcmask 883712   ;;  %vm1669_vm7 = vcmask 752640  }
   0x4   :  { %38 = vst [vmem:[#allocation2] sm:$0xff] %v7363_v6  ;;  %v31_v7 = vld [vmem:[%s8456_s0 + $0x28] sm:$0xff]  ;;  %50 = vst.msk [vmem:[#allocation2 + $0x58] sm:$0xff] %vm43_vm0, %v37_v8  ;;  %v7379_v9 = vld [vmem:[%s8456_s0 + $0x10] sm:$0xff]  ;;  %vm1940_vm8 = vcmask 744448   ;;  %vm2211_vm9 = vcmask 736256  }
   0x5   :  { %44 = vst.msk [vmem:[#allocation2 + $0x28] sm:$0xff] %vm43_vm0, %v31_v7  ;;  %v7394_v11 = vld [vmem:[%s8456_s0 + $0x18] sm:$0xff]  ;;  %v7399_v12 = vld [vmem:[%s8456_s0 + $0x20] sm:$0xff]  ;;  %s7278_s0 = smov 110   ;;  %v7150_v28 = vld [vmem:[%s8457_s2 + $0x8] sm:$0xff]  ;;  %vm2541_vm10 = vcmask 1047704  }
   0x6   :  { %95 = vrot.lane.b32.xlu0 %v7339_v2, %s7275_s30  ;;  %81 = vrot.lane.b32.xlu1 %v7348_v3, %s7275_s30  ;;  %v64_v40 = vld [vmem:[%s8457_s2] sm:$0xff]  ;;  %v7157_v52 = vld [vmem:[%s8457_s2 + $0x10] sm:$0xff]  ;;  %vm2529_vm11 = vcmask 154624   ;;  %vm2547_vm12 = vcmask 220160   ;;  %vm2587_vm13 = vcmask 64512  }
   0xa   :  { %83 = vrot.lane.b32.xlu0 %v7379_v9, %s7275_s30  ;;  %97 = vrot.lane.b32.xlu1 %v7353_v4, %s7275_s30 }
   0xb   :  { %v7405_v13 = vld [vmem:[#allocation2 + $0x58] sm:$0xff] }
   0xc   :  { %v7407_v14 = vld [vmem:[#allocation2 + $0x28] sm:$0xff] }
   0xe   :  { %99 = vrot.lane.b32.xlu0 %v7358_v5, %s7275_s30  ;;  %79 = vrot.lane.b32.xlu1 %v7363_v6, %s7275_s30 }
  0x12   :  { %85 = vrot.lane.b32.xlu0 %v7394_v11, %s7275_s30  ;;  %87 = vrot.lane.b32.xlu1 %v7399_v12, %s7275_s30 }
  0x16   :  { %101 = vrot.lane.b32.xlu0 %v7405_v13, %s7275_s30  ;;  %89 = vrot.lane.b32.xlu1 %v7407_v14, %s7275_s30 }
  0x1a   :  { %575 = vrot.lane.b32.xlu0 %v7329_v0, %s7277_s26  ;;  %577 = vrot.lane.b32.xlu1 %v7339_v2, %s7277_s26 }
  0x1e   :  { %573 = vrot.lane.b32.xlu0 %v7334_v1, %s7277_s26  ;;  %563 = vrot.lane.b32.xlu1 %v7348_v3, %s7277_s26 }
  0x22   :  { %565 = vrot.lane.b32.xlu0 %v7379_v9, %s7277_s26  ;;  %579 = vrot.lane.b32.xlu1 %v7353_v4, %s7277_s26 }
  0x26   :  { %581 = vrot.lane.b32.xlu0 %v7358_v5, %s7277_s26  ;;  %561 = vrot.lane.b32.xlu1 %v7363_v6, %s7277_s26 }
  0x2a   :  { %567 = vrot.lane.b32.xlu0 %v7394_v11, %s7277_s26  ;;  %569 = vrot.lane.b32.xlu1 %v7399_v12, %s7277_s26 }
  0x2e   :  { %583 = vrot.lane.b32.xlu0 %v7405_v13, %s7277_s26  ;;  %846 = vrot.lane.b32.xlu1 %v7329_v0, %s7278_s0 }
  0x32   :  { %848 = vrot.lane.b32.xlu0 %v7339_v2, %s7278_s0  ;;  %571 = vrot.lane.b32.xlu1 %v7407_v14, %s7277_s26 }
  0x36   :  { %844 = vrot.lane.b32.xlu0 %v7334_v1, %s7278_s0  ;;  %834 = vrot.lane.b32.xlu1 %v7348_v3, %s7278_s0 }
  0x3a   :  { %836 = vrot.lane.b32.xlu0 %v7379_v9, %s7278_s0  ;;  %850 = vrot.lane.b32.xlu1 %v7353_v4, %s7278_s0 }
  0x3e   :  { %852 = vrot.lane.b32.xlu0 %v7358_v5, %s7278_s0  ;;  %832 = vrot.lane.b32.xlu1 %v7363_v6, %s7278_s0 }
  0x42   :  { %838 = vrot.lane.b32.xlu0 %v7394_v11, %s7278_s0  ;;  %840 = vrot.lane.b32.xlu1 %v7399_v12, %s7278_s0 }
  0x46   :  { %854 = vrot.lane.b32.xlu0 %v7405_v13, %s7278_s0  ;;  %1117 = vrot.lane.b32.xlu1 %v7329_v0, %s7279_s27 }
  0x4a   :  { %1119 = vrot.lane.b32.xlu0 %v7339_v2, %s7279_s27  ;;  %842 = vrot.lane.b32.xlu1 %v7407_v14, %s7278_s0 }
  0x4e   :  { %1115 = vrot.lane.b32.xlu0 %v7334_v1, %s7279_s27  ;;  %1105 = vrot.lane.b32.xlu1 %v7348_v3, %s7279_s27 }
  0x52   :  { %1107 = vrot.lane.b32.xlu0 %v7379_v9, %s7279_s27  ;;  %1121 = vrot.lane.b32.xlu1 %v7353_v4, %s7279_s27 }
  0x56   :  { %1123 = vrot.lane.b32.xlu0 %v7358_v5, %s7279_s27  ;;  %1103 = vrot.lane.b32.xlu1 %v7363_v6, %s7279_s27 }
  0x5a   :  { %1109 = vrot.lane.b32.xlu0 %v7394_v11, %s7279_s27  ;;  %1111 = vrot.lane.b32.xlu1 %v7399_v12, %s7279_s27 }
  0x5e   :  { %1125 = vrot.lane.b32.xlu0 %v7405_v13, %s7279_s27  ;;  %1388 = vrot.lane.b32.xlu1 %v7329_v0, %s7280_s28 }
  0x62   :  { %1390 = vrot.lane.b32.xlu0 %v7339_v2, %s7280_s28  ;;  %1113 = vrot.lane.b32.xlu1 %v7407_v14, %s7279_s27 }
  0x66   :  { %1386 = vrot.lane.b32.xlu0 %v7334_v1, %s7280_s28  ;;  %1376 = vrot.lane.b32.xlu1 %v7348_v3, %s7280_s28 }
  0x6a   :  { %1378 = vrot.lane.b32.xlu0 %v7379_v9, %s7280_s28  ;;  %1392 = vrot.lane.b32.xlu1 %v7353_v4, %s7280_s28 }
  0x6e   :  { %1394 = vrot.lane.b32.xlu0 %v7358_v5, %s7280_s28  ;;  %1374 = vrot.lane.b32.xlu1 %v7363_v6, %s7280_s28 }
  0x72   :  { %1380 = vrot.lane.b32.xlu0 %v7394_v11, %s7280_s28  ;;  %1382 = vrot.lane.b32.xlu1 %v7399_v12, %s7280_s28 }
  0x74   :  { %v94_v15 = vpop.permute.xlu0 %93  ;;  %v92_v16 = vpop.permute.xlu1 %91 }
  0x75   :  { %v109_v20 = vsel %vm103_vm1, %v92_v16, %v94_v15 }
  0x76   :  { %1396 = vrot.lane.b32.xlu0 %v7405_v13, %s7280_s28  ;;  %1659 = vrot.lane.b32.xlu1 %v7329_v0, %s7281_s29 }
  0x78   :  { %v96_v17 = vpop.permute.xlu0 %95  ;;  %v82_v18 = vpop.permute.xlu1 %81 }
  0x79   :  { %v110_v19 = vsel %vm103_vm1, %v94_v15, %v96_v17 }
  0x7a   :  { %158 = vmatprep.subr.mxu0 %v110_v19  ;;  %1661 = vrot.lane.b32.xlu0 %v7339_v2, %s7281_s29 }
  0x7b   :  { %1384 = vrot.lane.b32.xlu1 %v7407_v14, %s7280_s28  ;;  %159 = vmatpush1.msra.mxu0 %v109_v20 }
  0x7c   :  { %v84_v21 = vpop.permute.xlu0 %83  ;;  %v98_v22 = vpop.permute.xlu1 %97 }
  0x7d   :  { %v105_v23 = vsel %vm103_vm1, %v82_v18, %v84_v21  ;;  %v111_v29 = vsel %vm103_vm1, %v96_v17, %v98_v22 }
  0x7e   :  { %1657 = vrot.lane.b32.xlu0 %v7334_v1, %s7281_s29  ;;  %160 = vmatprep.subr.mxu0 %v105_v23 }
  0x7f   :  { %1647 = vrot.lane.b32.xlu1 %v7348_v3, %s7281_s29 }
  0x80   :  { %v100_v24 = vpop.permute.xlu0 %99  ;;  %v80_v25 = vpop.permute.xlu1 %79 }
  0x81   :  { %v112_v26 = vsel %vm103_vm1, %v98_v22, %v100_v24  ;;  %v104_v27 = vsel %vm103_vm1, %v80_v25, %v82_v18  ;;  %v7161_v22 = vld [vmem:[%s8457_s2 + $0x18] sm:$0xff] }
  0x82   :  { %1649 = vrot.lane.b32.xlu0 %v7379_v9, %s7281_s29  ;;  %229 = vmatprep.subr.mxu1 %v112_v26  ;;  %v7284_v26 = vmov 0  }
  0x83   :  { %1663 = vrot.lane.b32.xlu1 %v7353_v4, %s7281_s29  ;;  %161 = vmatpush1.msra.mxu0 %v104_v27 }
  0x84   :  { %230 = vmatpush1.msra.mxu1 %v111_v29  ;;  %v86_v30 = vpop.permute.xlu0 %85  ;;  %v88_v31 = vpop.permute.xlu1 %87  ;;  %7151 = vmatmul.mubr.msk.f32.vlgmr.msra.gmra.mxu0 %vm126_vm2, %v7150_v28 }
  0x85   :  { %v107_v32 = vsel %vm103_vm1, %v86_v30, %v88_v31  ;;  %v106_v33 = vsel %vm103_vm1, %v84_v21, %v86_v30  ;;  %336 = vmatprep.mubr.f32.mxu0 %v7276_v10  ;;  %7269 = vset.pattern.permute.xlu0 %v7284_v26 }
  0x86   :  { %1665 = vrot.lane.b32.xlu0 %v7358_v5, %s7281_s29  ;;  %231 = vmatprep.subr.mxu1 %v107_v32 }
  0x87   :  { %1645 = vrot.lane.b32.xlu1 %v7363_v6, %s7281_s29  ;;  %232 = vmatpush1.msra.mxu1 %v106_v33 }
  0x88   :  { %v102_v34 = vpop.permute.xlu0 %101  ;;  %v90_v35 = vpop.permute.xlu1 %89  ;;  %374 = vmatprep.subr.mxu1 %v7329_v0  ;;  %7152 = vmatmul.mubr.msk.f32.vlgmr.msra.gmra.mxu1 %vm126_vm2, %v7150_v28 }
  0x89   :  { %300 = vmatprep.subr.mxu0 %v102_v34  ;;  %v113_v36 = vsel %vm103_vm1, %v100_v24, %v102_v34  ;;  %375 = vmatpush1.msra.mxu1 %v7334_v1  ;;  %v108_v37 = vsel %vm103_vm1, %v88_v31, %v90_v35 }
  0x8a   :  { %1651 = vrot.lane.b32.xlu0 %v7394_v11, %s7281_s29  ;;  %301 = vmatpush1.msra.mxu0 %v113_v36 }
  0x8b   :  { %1653 = vrot.lane.b32.xlu1 %v7399_v12, %s7281_s29  ;;  %302 = vmatprep.subr.mxu0 %v90_v35  ;;  %v7165_v35 = vld [vmem:[%s8457_s2 + $0x20] sm:$0xff] }
  0x8c   :  { %v576_v38 = vpop.permute.xlu0 %575  ;;  %303 = vmatpush1.msra.mxu0 %v108_v37  ;;  %v578_v39 = vpop.permute.xlu1 %577  ;;  %376 = vmatprep.subr.mxu1 %v7348_v3 }
  0x8d   :  { %445 = vmatprep.subr.mxu0 %v7353_v4  ;;  %7153 = vmatmul.mubr.msk.f32.vlgmr.msra.gmra.mxu0 %vm126_vm2, %v7150_v28  ;;  %v592_v43 = vsel %vm585_vm3, %v576_v38, %v578_v39 }
  0x8e   :  { %1667 = vrot.lane.b32.xlu0 %v7405_v13, %s7281_s29  ;;  %446 = vmatpush1.msra.mxu0 %v7339_v2 }
  0x8f   :  { %1930 = vrot.lane.b32.xlu1 %v7329_v0, %s7282_s12  ;;  %447 = vmatprep.subr.mxu0 %v7394_v11 }
  0x90   :  { %v574_v41 = vpop.permute.xlu0 %573  ;;  %448 = vmatpush1.msra.mxu0 %v7379_v9  ;;  %v564_v42 = vpop.permute.xlu1 %563  ;;  %481 = vmatprep.mubr.f32.mxu0 %v7276_v10 }
  0x91   :  { %v591_v44 = vsel %vm585_vm3, %v574_v41, %v576_v38  ;;  %639 = vmatprep.subr.mxu0 %v592_v43  ;;  %7155 = vmatmul.mubr.msk.f32.vlgmr.msra.gmra.mxu0 %vm126_vm2, %v64_v40 }
  0x92   :  { %1932 = vrot.lane.b32.xlu0 %v7339_v2, %s7282_s12  ;;  %640 = vmatpush1.msra.mxu0 %v591_v44 }
  0x93   :  { %1655 = vrot.lane.b32.xlu1 %v7407_v14, %s7281_s29  ;;  %377 = vmatpush1.msra.mxu1 %v7363_v6 }
  0x94   :  { %v566_v45 = vpop.permute.xlu0 %565  ;;  %v580_v46 = vpop.permute.xlu1 %579  ;;  %410 = vmatprep.mubr.f32.mxu1 %v7276_v10  ;;  %516 = vmatprep.subr.mxu1 %v7405_v13 }
  0x95   :  { %v587_v47 = vsel %vm585_vm3, %v564_v42, %v566_v45  ;;  %7154 = vmatmul.mubr.msk.f32.vlgmr.msra.gmra.mxu1 %vm126_vm2, %v64_v40  ;;  %675 = vmatprep.mubr.f32.mxu0 %v7276_v10  ;;  %v593_v53 = vsel %vm585_vm3, %v578_v39, %v580_v46 }
  0x96   :  { %1928 = vrot.lane.b32.xlu0 %v7334_v1, %s7282_s12  ;;  %641 = vmatprep.subr.mxu0 %v587_v47 }
  0x97   :  { %1918 = vrot.lane.b32.xlu1 %v7348_v3, %s7282_s12  ;;  %517 = vmatpush1.msra.mxu1 %v7358_v5 }
  0x98   :  { %v582_v48 = vpop.permute.xlu0 %581  ;;  %518 = vmatprep.subr.mxu1 %v7407_v14  ;;  %v562_v49 = vpop.permute.xlu1 %561  ;;  %552 = vmatprep.mubr.f32.mxu1 %v7276_v10 }
  0x99   :  { %v586_v50 = vsel %vm585_vm3, %v562_v49, %v564_v42  ;;  %519 = vmatpush1.msra.mxu1 %v7399_v12  ;;  %v594_v51 = vsel %vm585_vm3, %v580_v46, %v582_v48  ;;  %7270 = vset.pattern.permute.xlu1 %v7284_v26 }
  0x9a   :  { %1920 = vrot.lane.b32.xlu0 %v7379_v9, %s7282_s12  ;;  %642 = vmatpush1.msra.mxu0 %v586_v50 }
  0x9b   :  { %1934 = vrot.lane.b32.xlu1 %v7353_v4, %s7282_s12  ;;  %710 = vmatprep.subr.mxu1 %v594_v51 }
  0x9c   :  { %7156 = vmatmul.mubr.msk.f32.vlgmr.msra.gmra.mxu1 %vm126_vm2, %v64_v40  ;;  %v568_v54 = vpop.permute.xlu0 %567  ;;  %v570_v55 = vpop.permute.xlu1 %569  ;;  %7158 = vmatmul.mubr.msk.f32.vlgmr.msra.gmra.mxu0 %vm126_vm2, %v7157_v52 }
  0x9d   :  { %711 = vmatpush1.msra.mxu1 %v593_v53  ;;  %v589_v56 = vsel %vm585_vm3, %v568_v54, %v570_v55  ;;  %v588_v57 = vsel %vm585_vm3, %v566_v45, %v568_v54  ;;  %746 = vmatprep.mubr.f32.mxu1 %v7276_v10 }
  0x9e   :  { %1936 = vrot.lane.b32.xlu0 %v7358_v5, %s7282_s12  ;;  %712 = vmatprep.subr.mxu1 %v589_v56 }
  0x9f   :  { %1916 = vrot.lane.b32.xlu1 %v7363_v6, %s7282_s12  ;;  %713 = vmatpush1.msra.mxu1 %v588_v57 }
  0xa0   :  { %v584_v58 = vpop.permute.xlu0 %583  ;;  %v847_v59 = vpop.permute.xlu1 %846  ;;  %7159 = vmatmul.mubr.msk.f32.vlgmr.msra.gmra.mxu1 %vm126_vm2, %v7157_v52  ;;  %817 = vmatprep.mubr.f32.mxu0 %v7276_v10 }
  0xa1   :  { %781 = vmatprep.subr.mxu0 %v584_v58  ;;  %v595_v60 = vsel %vm585_vm3, %v582_v48, %v584_v58  ;;  %946 = vmatprep.mubr.f32.mxu1 %v7276_v10  ;;  %v7169_v58 = vld [vmem:[%s8457_s2 + $0x28] sm:$0xff] }
  0xa2   :  { %1922 = vrot.lane.b32.xlu0 %v7394_v11, %s7282_s12  ;;  %782 = vmatpush1.msra.mxu0 %v595_v60 }
  0xa3   :  { %1924 = vrot.lane.b32.xlu1 %v7399_v12, %s7282_s12 }
  0xa4   :  { %v849_v61 = vpop.permute.xlu0 %848  ;;  %v572_v62 = vpop.permute.xlu1 %571 }
  0xa5   :  { %783 = vmatprep.subr.mxu0 %v572_v62  ;;  %v590_v63 = vsel %vm585_vm3, %v570_v55, %v572_v62  ;;  %v863_v7 = vsel %vm856_vm4, %v847_v59, %v849_v61 }
  0xa6   :  { %1938 = vrot.lane.b32.xlu0 %v7405_v13, %s7282_s12  ;;  %784 = vmatpush1.msra.mxu0 %v590_v63 }
  0xa7   :  { %2201 = vrot.lane.b32.xlu1 %v7329_v0, %s7283_s15  ;;  %910 = vmatprep.subr.mxu1 %v863_v7 }
  0xa8   :  { %v845_v8 = vpop.permute.xlu0 %844  ;;  %v835_v15 = vpop.permute.xlu1 %834  ;;  %7160 = vmatmul.mubr.msk.f32.vlgmr.msra.gmra.mxu0 %vm126_vm2, %v7157_v52 }
  0xa9   :  { %v862_v16 = vsel %vm856_vm4, %v845_v8, %v847_v59  ;;  %1017 = vmatprep.mubr.f32.mxu0 %v7276_v10 }
  0xaa   :  { %2203 = vrot.lane.b32.xlu0 %v7339_v2, %s7283_s15  ;;  %911 = vmatpush1.msra.mxu1 %v862_v16 }
  0xab   :  { %1926 = vrot.lane.b32.xlu1 %v7407_v14, %s7282_s12 }
  0xac   :  { %v837_v17 = vpop.permute.xlu0 %836  ;;  %v851_v18 = vpop.permute.xlu1 %850 }
  0xad   :  { %v858_v0 = vsel %vm856_vm4, %v835_v15, %v837_v17 }
  0xae   :  { %2199 = vrot.lane.b32.xlu0 %v7334_v1, %s7283_s15  ;;  %912 = vmatprep.subr.mxu1 %v858_v0  ;;  %v864_v1 = vsel %vm856_vm4, %v849_v61, %v851_v18 }
  0xaf   :  { %2189 = vrot.lane.b32.xlu1 %v7348_v3, %s7283_s15 }
  0xb0   :  { %v853_v19 = vpop.permute.xlu0 %852  ;;  %v833_v20 = vpop.permute.xlu1 %832 }
  0xb1   :  { %v857_v21 = vsel %vm856_vm4, %v833_v20, %v835_v15  ;;  %v865_v2 = vsel %vm856_vm4, %v851_v18, %v853_v19 }
  0xb2   :  { %2191 = vrot.lane.b32.xlu0 %v7379_v9, %s7283_s15  ;;  %913 = vmatpush1.msra.mxu1 %v857_v21 }
  0xb3   :  { %2205 = vrot.lane.b32.xlu1 %v7353_v4, %s7283_s15  ;;  %981 = vmatprep.subr.mxu0 %v865_v2 }
  0xb4   :  { %982 = vmatpush1.msra.mxu0 %v864_v1  ;;  %v839_v3 = vpop.permute.xlu0 %838  ;;  %v841_v23 = vpop.permute.xlu1 %840  ;;  %7162 = vmatmul.mubr.msk.f32.vlgmr.msra.gmra.mxu1 %vm126_vm2, %v7161_v22 }
  0xb5   :  { %v860_v24 = vsel %vm856_vm4, %v839_v3, %v841_v23  ;;  %v859_v25 = vsel %vm856_vm4, %v837_v17, %v839_v3  ;;  %1088 = vmatprep.mubr.f32.mxu1 %v7276_v10 }
  0xb6   :  { %2207 = vrot.lane.b32.xlu0 %v7358_v5, %s7283_s15  ;;  %983 = vmatprep.subr.mxu0 %v860_v24 }
  0xb7   :  { %2187 = vrot.lane.b32.xlu1 %v7363_v6, %s7283_s15  ;;  %984 = vmatpush1.msra.mxu0 %v859_v25 }
  0xb8   :  { %v855_v4 = vpop.permute.xlu0 %854  ;;  %v1118_v9 = vpop.permute.xlu1 %1117  ;;  %7163 = vmatmul.mubr.msk.f32.vlgmr.msra.gmra.mxu0 %vm126_vm2, %v7161_v22 }
  0xb9   :  { %1052 = vmatprep.subr.mxu1 %v855_v4  ;;  %v866_v27 = vsel %vm856_vm4, %v853_v19, %v855_v4  ;;  %1217 = vmatprep.mubr.f32.mxu0 %v7276_v10 }
  0xba   :  { %2193 = vrot.lane.b32.xlu0 %v7394_v11, %s7283_s15  ;;  %1053 = vmatpush1.msra.mxu1 %v866_v27  ;;  %v2456_v11 = vld [vmem:[%s8458_s3] sm:$0xff] }
  0xbb   :  { %2195 = vrot.lane.b32.xlu1 %v7399_v12, %s7283_s15 }
  0xbc   :  { %v1120_v5 = vpop.permute.xlu0 %1119  ;;  %v843_v6 = vpop.permute.xlu1 %842 }
  0xbd   :  { %1054 = vmatprep.subr.mxu1 %v843_v6  ;;  %v861_v28 = vsel %vm856_vm4, %v841_v23, %v843_v6  ;;  %v1134_v29 = vsel %vm1127_vm5, %v1118_v9, %v1120_v5 }
  0xbe   :  { %2209 = vrot.lane.b32.xlu0 %v7405_v13, %s7283_s15  ;;  %1055 = vmatpush1.msra.mxu1 %v861_v28 }
  0xbf   :  { %2197 = vrot.lane.b32.xlu1 %v7407_v14, %s7283_s15  ;;  %1181 = vmatprep.subr.mxu0 %v1134_v29 }
  0xc0   :  { %v1116_v12 = vpop.permute.xlu0 %1115  ;;  %v1106_v30 = vpop.permute.xlu1 %1105  ;;  %7164 = vmatmul.mubr.msk.f32.vlgmr.msra.gmra.mxu1 %vm126_vm2, %v7161_v22 }
  0xc1   :  { %v1133_v31 = vsel %vm1127_vm5, %v1116_v12, %v1118_v9  ;;  %1288 = vmatprep.mubr.f32.mxu1 %v7276_v10  ;;  %v7173_v9 = vld [vmem:[%s8457_s2 + $0x30] sm:$0xff] }
  0xc2   :  { %1182 = vmatpush1.msra.mxu0 %v1133_v31  ;;  %2459 = vperm.xlu0 %7269, %v2456_v11  }
  0xc4   :  { %v1108_v13 = vpop.permute.xlu0 %1107  ;;  %v1122_v32 = vpop.permute.xlu1 %1121 }
  0xc5   :  { %v1129_v33 = vsel %vm1127_vm5, %v1106_v30, %v1108_v13  ;;  %v1135_v38 = vsel %vm1127_vm5, %v1120_v5, %v1122_v32 }
  0xc6   :  { %1183 = vmatprep.subr.mxu0 %v1129_v33 }
  0xc8   :  { %v1124_v14 = vpop.permute.xlu0 %1123  ;;  %v1104_v34 = vpop.permute.xlu1 %1103 }
  0xc9   :  { %v1128_v36 = vsel %vm1127_vm5, %v1104_v34, %v1106_v30  ;;  %v1136_v37 = vsel %vm1127_vm5, %v1122_v32, %v1124_v14 }
  0xca   :  { %1184 = vmatpush1.msra.mxu0 %v1128_v36  ;;  %1252 = vmatprep.subr.mxu1 %v1136_v37 }
  0xcb   :  { %1253 = vmatpush1.msra.mxu1 %v1135_v38  ;;  %7166 = vmatmul.mubr.msk.f32.vlgmr.msra.gmra.mxu0 %vm126_vm2, %v7165_v35 }
  0xcc   :  { %v1110_v39 = vpop.permute.xlu0 %1109  ;;  %v1112_v40 = vpop.permute.xlu1 %1111  ;;  %1359 = vmatprep.mubr.f32.mxu0 %v7276_v10 }
  0xcd   :  { %v1131_v41 = vsel %vm1127_vm5, %v1110_v39, %v1112_v40  ;;  %v1130_v42 = vsel %vm1127_vm5, %v1108_v13, %v1110_v39 }
  0xce   :  { %1254 = vmatprep.subr.mxu1 %v1131_v41 }
  0xcf   :  { %1255 = vmatpush1.msra.mxu1 %v1130_v42  ;;  %v7177_v42 = vld [vmem:[%s8457_s2 + $0x38] sm:$0xff] }
  0xd0   :  { %v1126_v43 = vpop.permute.xlu0 %1125  ;;  %v1389_v44 = vpop.permute.xlu1 %1388  ;;  %7167 = vmatmul.mubr.msk.f32.vlgmr.msra.gmra.mxu1 %vm126_vm2, %v7165_v35 }
  0xd1   :  { %1323 = vmatprep.subr.mxu0 %v1126_v43  ;;  %v1137_v45 = vsel %vm1127_vm5, %v1124_v14, %v1126_v43  ;;  %1488 = vmatprep.mubr.f32.mxu1 %v7276_v10 }
  0xd2   :  { %1324 = vmatpush1.msra.mxu0 %v1137_v45 }
  0xd4   :  { %v1391_v46 = vpop.permute.xlu0 %1390  ;;  %v1114_v47 = vpop.permute.xlu1 %1113 }
  0xd5   :  { %1325 = vmatprep.subr.mxu0 %v1114_v47  ;;  %v1132_v48 = vsel %vm1127_vm5, %v1112_v40, %v1114_v47  ;;  %v1405_v49 = vsel %vm1398_vm6, %v1389_v44, %v1391_v46 }
  0xd6   :  { %1326 = vmatpush1.msra.mxu0 %v1132_v48  ;;  %1452 = vmatprep.subr.mxu1 %v1405_v49 }
  0xd7   :  { %7168 = vmatmul.mubr.msk.f32.vlgmr.msra.gmra.mxu0 %vm126_vm2, %v7165_v35 }
  0xd8   :  { %v1387_v50 = vpop.permute.xlu0 %1386  ;;  %v1377_v51 = vpop.permute.xlu1 %1376  ;;  %1559 = vmatprep.mubr.f32.mxu0 %v7276_v10 }
  0xd9   :  { %v1404_v52 = vsel %vm1398_vm6, %v1387_v50, %v1389_v44 }
  0xda   :  { %1453 = vmatpush1.msra.mxu1 %v1404_v52 }
  0xdc   :  { %v1379_v53 = vpop.permute.xlu0 %1378  ;;  %v1393_v54 = vpop.permute.xlu1 %1392 }
  0xdd   :  { %v1400_v55 = vsel %vm1398_vm6, %v1377_v51, %v1379_v53  ;;  %v1406_v61 = vsel %vm1398_vm6, %v1391_v46, %v1393_v54 }
  0xde   :  { %1454 = vmatprep.subr.mxu1 %v1400_v55 }
  0xe0   :  { %v1395_v56 = vpop.permute.xlu0 %1394  ;;  %v1375_v57 = vpop.permute.xlu1 %1374 }
  0xe1   :  { %v1399_v59 = vsel %vm1398_vm6, %v1375_v57, %v1377_v51  ;;  %v1407_v60 = vsel %vm1398_vm6, %v1393_v54, %v1395_v56 }
  0xe2   :  { %1455 = vmatpush1.msra.mxu1 %v1399_v59  ;;  %1523 = vmatprep.subr.mxu0 %v1407_v60 }
  0xe3   :  { %1524 = vmatpush1.msra.mxu0 %v1406_v61  ;;  %7170 = vmatmul.mubr.msk.f32.vlgmr.msra.gmra.mxu1 %vm126_vm2, %v7169_v58 }
  0xe4   :  { %v1381_v62 = vpop.permute.xlu0 %1380  ;;  %v1383_v63 = vpop.permute.xlu1 %1382  ;;  %1630 = vmatprep.mubr.f32.mxu1 %v7276_v10 }
  0xe5   :  { %v1402_v7 = vsel %vm1398_vm6, %v1381_v62, %v1383_v63  ;;  %v1401_v8 = vsel %vm1398_vm6, %v1379_v53, %v1381_v62 }
  0xe6   :  { %1525 = vmatprep.subr.mxu0 %v1402_v7 }
  0xe7   :  { %1526 = vmatpush1.msra.mxu0 %v1401_v8  ;;  %v7181_v8 = vld [vmem:[%s8457_s2 + $0x40] sm:$0xff] }
  0xe8   :  { %v1397_v15 = vpop.permute.xlu0 %1396  ;;  %v1660_v16 = vpop.permute.xlu1 %1659  ;;  %7171 = vmatmul.mubr.msk.f32.vlgmr.msra.gmra.mxu0 %vm126_vm2, %v7169_v58 }
  0xe9   :  { %1594 = vmatprep.subr.mxu1 %v1397_v15  ;;  %v1408_v17 = vsel %vm1398_vm6, %v1395_v56, %v1397_v15  ;;  %1759 = vmatprep.mubr.f32.mxu0 %v7276_v10 }
  0xea   :  { %1595 = vmatpush1.msra.mxu1 %v1408_v17 }
  0xec   :  { %v1662_v18 = vpop.permute.xlu0 %1661 }
  0xed   :  { %v1385_v0 = vpop.permute.xlu1 %1384  ;;  %v1676_v19 = vsel %vm1669_vm7, %v1660_v16, %v1662_v18 }
  0xee   :  { %1596 = vmatprep.subr.mxu1 %v1385_v0  ;;  %v1403_v20 = vsel %vm1398_vm6, %v1383_v63, %v1385_v0  ;;  %1723 = vmatprep.subr.mxu0 %v1676_v19 }
  0xef   :  { %1597 = vmatpush1.msra.mxu1 %v1403_v20 }
  0xf0   :  { %v1658_v21 = vpop.permute.xlu0 %1657  ;;  %7172 = vmatmul.mubr.msk.f32.vlgmr.msra.gmra.mxu1 %vm126_vm2, %v7169_v58 }
  0xf1   :  { %v1675_v2 = vsel %vm1669_vm7, %v1658_v21, %v1660_v16  ;;  %v1648_v22 = vpop.permute.xlu1 %1647  ;;  %1830 = vmatprep.mubr.f32.mxu1 %v7276_v10 }
  0xf2   :  { %1724 = vmatpush1.msra.mxu0 %v1675_v2 }
  0xf4   :  { %v1650_v1 = vpop.permute.xlu0 %1649 }
  0xf5   :  { %v1664_v3 = vpop.permute.xlu1 %1663  ;;  %v1671_v23 = vsel %vm1669_vm7, %v1648_v22, %v1650_v1 }
  0xf6   :  { %1725 = vmatprep.subr.mxu0 %v1671_v23  ;;  %v1677_v27 = vsel %vm1669_vm7, %v1662_v18, %v1664_v3 }
  0xf8   :  { %v1666_v24 = vpop.permute.xlu0 %1665 }
  0xf9   :  { %v1646_v25 = vpop.permute.xlu1 %1645  ;;  %v1678_v4 = vsel %vm1669_vm7, %v1664_v3, %v1666_v24 }
  0xfa   :  { %v1670_v26 = vsel %vm1669_vm7, %v1646_v25, %v1648_v22  ;;  %1794 = vmatprep.subr.mxu1 %v1678_v4 }
  0xfb   :  { %1726 = vmatpush1.msra.mxu0 %v1670_v26  ;;  %1795 = vmatpush1.msra.mxu1 %v1677_v27 }
  0xfc   :  { %v1652_v5 = vpop.permute.xlu0 %1651  ;;  %7174 = vmatmul.mubr.msk.f32.vlgmr.msra.gmra.mxu0 %vm126_vm2, %v7173_v9 }
  0xfd   :  { %v1654_v6 = vpop.permute.xlu1 %1653  ;;  %v1672_v28 = vsel %vm1669_vm7, %v1650_v1, %v1652_v5  ;;  %1901 = vmatprep.mubr.f32.mxu0 %v7276_v10 }
  0xfe   :  { %v1673_v29 = vsel %vm1669_vm7, %v1652_v5, %v1654_v6 }
  0xff   :  { %1796 = vmatprep.subr.mxu1 %v1673_v29 }
 0x100   :  { %1797 = vmatpush1.msra.mxu1 %v1672_v28  ;;  %v1668_v11 = vpop.permute.xlu0 %1667 }
 0x101   :  { %v1931_v12 = vpop.permute.xlu1 %1930  ;;  %1865 = vmatprep.subr.mxu0 %v1668_v11  ;;  %v1679_v30 = vsel %vm1669_vm7, %v1666_v24, %v1668_v11  ;;  %7175 = vmatmul.mubr.msk.f32.vlgmr.msra.gmra.mxu1 %vm126_vm2, %v7173_v9 }
 0x102   :  { %1866 = vmatpush1.msra.mxu0 %v1679_v30  ;;  %2030 = vmatprep.mubr.f32.mxu1 %v7276_v10 }
 0x104   :  { %v1933_v31 = vpop.permute.xlu0 %1932 }
 0x105   :  { %v1656_v13 = vpop.permute.xlu1 %1655  ;;  %v1947_v32 = vsel %vm1940_vm8, %v1931_v12, %v1933_v31 }
 0x106   :  { %1867 = vmatprep.subr.mxu0 %v1656_v13  ;;  %v1674_v33 = vsel %vm1669_vm7, %v1654_v6, %v1656_v13  ;;  %1994 = vmatprep.subr.mxu1 %v1947_v32 }
 0x107   :  { %1868 = vmatpush1.msra.mxu0 %v1674_v33 }
 0x108   :  { %v1929_v14 = vpop.permute.xlu0 %1928  ;;  %7176 = vmatmul.mubr.msk.f32.vlgmr.msra.gmra.mxu0 %vm126_vm2, %v7173_v9 }
 0x109   :  { %v1946_v34 = vsel %vm1940_vm8, %v1929_v14, %v1931_v12  ;;  %v1919_v35 = vpop.permute.xlu1 %1918  ;;  %2101 = vmatprep.mubr.f32.mxu0 %v7276_v10 }
 0x10a   :  { %1995 = vmatpush1.msra.mxu1 %v1946_v34 }
 0x10c   :  { %v1921_v36 = vpop.permute.xlu0 %1920 }
 0x10d   :  { %v1935_v37 = vpop.permute.xlu1 %1934  ;;  %v1942_v38 = vsel %vm1940_vm8, %v1919_v35, %v1921_v36 }
 0x10e   :  { %1996 = vmatprep.subr.mxu1 %v1942_v38  ;;  %v1948_v44 = vsel %vm1940_vm8, %v1933_v31, %v1935_v37 }
 0x110   :  { %v1937_v39 = vpop.permute.xlu0 %1936 }
 0x111   :  { %v1917_v40 = vpop.permute.xlu1 %1916  ;;  %v1949_v41 = vsel %vm1940_vm8, %v1935_v37, %v1937_v39 }
 0x112   :  { %v1941_v43 = vsel %vm1940_vm8, %v1917_v40, %v1919_v35  ;;  %2065 = vmatprep.subr.mxu0 %v1949_v41 }
 0x113   :  { %1997 = vmatpush1.msra.mxu1 %v1941_v43  ;;  %2066 = vmatpush1.msra.mxu0 %v1948_v44 }
 0x114   :  { %7178 = vmatmul.mubr.msk.f32.vlgmr.msra.gmra.mxu1 %vm126_vm2, %v7177_v42  ;;  %v1923_v45 = vpop.permute.xlu0 %1922 }
 0x115   :  { %v1925_v46 = vpop.permute.xlu1 %1924  ;;  %v1943_v47 = vsel %vm1940_vm8, %v1921_v36, %v1923_v45  ;;  %2172 = vmatprep.mubr.f32.mxu1 %v7276_v10 }
 0x116   :  { %v1944_v48 = vsel %vm1940_vm8, %v1923_v45, %v1925_v46 }
 0x117   :  { %2067 = vmatprep.subr.mxu0 %v1944_v48 }
 0x118   :  { %2068 = vmatpush1.msra.mxu0 %v1943_v47  ;;  %v1939_v49 = vpop.permute.xlu0 %1938 }
 0x119   :  { %7179 = vmatmul.mubr.msk.f32.vlgmr.msra.gmra.mxu0 %vm126_vm2, %v7177_v42  ;;  %v2202_v50 = vpop.permute.xlu1 %2201  ;;  %2136 = vmatprep.subr.mxu1 %v1939_v49  ;;  %v1950_v51 = vsel %vm1940_vm8, %v1937_v39, %v1939_v49 }
 0x11a   :  { %2137 = vmatpush1.msra.mxu1 %v1950_v51  ;;  %2301 = vmatprep.mubr.f32.mxu0 %v7276_v10 }
 0x11c   :  { %v2204_v52 = vpop.permute.xlu0 %2203 }
 0x11d   :  { %v1927_v53 = vpop.permute.xlu1 %1926  ;;  %v2218_v54 = vsel %vm2211_vm9, %v2202_v50, %v2204_v52 }
 0x11e   :  { %2138 = vmatprep.subr.mxu1 %v1927_v53  ;;  %v1945_v55 = vsel %vm1940_vm8, %v1925_v46, %v1927_v53  ;;  %2265 = vmatprep.subr.mxu0 %v2218_v54 }
 0x11f   :  { %2139 = vmatpush1.msra.mxu1 %v1945_v55 }
 0x120   :  { %7180 = vmatmul.mubr.msk.f32.vlgmr.msra.gmra.mxu1 %vm126_vm2, %v7177_v42  ;;  %v2200_v56 = vpop.permute.xlu0 %2199 }
 0x121   :  { %v2217_v57 = vsel %vm2211_vm9, %v2200_v56, %v2202_v50  ;;  %v2190_v58 = vpop.permute.xlu1 %2189  ;;  %2372 = vmatprep.mubr.f32.mxu1 %v7276_v10 }
 0x122   :  { %2266 = vmatpush1.msra.mxu0 %v2217_v57 }
 0x124   :  { %v2192_v59 = vpop.permute.xlu0 %2191 }
 0x125   :  { %v2206_v60 = vpop.permute.xlu1 %2205  ;;  %v2213_v61 = vsel %vm2211_vm9, %v2190_v58, %v2192_v59 }
 0x126   :  { %2267 = vmatprep.subr.mxu0 %v2213_v61  ;;  %v2219_v16 = vsel %vm2211_vm9, %v2204_v52, %v2206_v60 }
 0x128   :  { %v2208_v62 = vpop.permute.xlu0 %2207 }
 0x129   :  { %v2188_v63 = vpop.permute.xlu1 %2187  ;;  %v2220_v7 = vsel %vm2211_vm9, %v2206_v60, %v2208_v62 }
 0x12a   :  { %v2212_v15 = vsel %vm2211_vm9, %v2188_v63, %v2190_v58  ;;  %2336 = vmatprep.subr.mxu1 %v2220_v7 }
 0x12b   :  { %2268 = vmatpush1.msra.mxu0 %v2212_v15  ;;  %2337 = vmatpush1.msra.mxu1 %v2219_v16 }
 0x12c   :  { %7182 = vmatmul.mubr.msk.f32.vlgmr.msra.gmra.mxu0 %vm126_vm2, %v7181_v8  ;;  %v2194_v17 = vpop.permute.xlu0 %2193 }
 0x12d   :  { %v2196_v18 = vpop.permute.xlu1 %2195  ;;  %v2214_v0 = vsel %vm2211_vm9, %v2192_v59, %v2194_v17  ;;  %2443 = vmatprep.mubr.f32.mxu0 %v7276_v10 }
 0x12e   :  { %v2215_v19 = vsel %vm2211_vm9, %v2194_v17, %v2196_v18 }
 0x12f   :  { %2338 = vmatprep.subr.mxu1 %v2215_v19 }
 0x130   :  { %2339 = vmatpush1.msra.mxu1 %v2214_v0  ;;  %v2210_v20 = vpop.permute.xlu0 %2209  ;;  %v2475_v0 = vlaneseq }
 0x131   :  { %7183 = vmatmul.mubr.msk.f32.vlgmr.msra.gmra.mxu1 %vm126_vm2, %v7181_v8  ;;  %v2198_v21 = vpop.permute.xlu1 %2197  ;;  %2407 = vmatprep.subr.mxu0 %v2210_v20  ;;  %v2221_v2 = vsel %vm2211_vm9, %v2208_v62, %v2210_v20 }
 0x132   :  { %2408 = vmatpush1.msra.mxu0 %v2221_v2  ;;  %v2216_v22 = vsel %vm2211_vm9, %v2196_v18, %v2198_v21  ;;  %2655 = vmatprep.mubr.f32.mxu1 %v7276_v10 }
 0x133   :  { %2409 = vmatprep.subr.mxu0 %v2198_v21 }
 0x134   :  { %2410 = vmatpush1.msra.mxu0 %v2216_v22 }
 0x135   :  { %7184 = vmatmul.mubr.msk.f32.vlgmr.msra.gmra.mxu0 %vm126_vm2, %v7181_v8 }
 0x136   :  { %2726 = vmatprep.mubr.f32.mxu0 %v7276_v10 }
 0x144   :  { %v196_v1 = vpop.f32.mrf.mxu0 }
 0x146   :  { %v198_v3 = vpop.f32.mrf.mxu0 }
 0x148   :  { %v267_v23 = vpop.f32.mrf.mxu1 }
 0x14a   :  { %v269_v25 = vpop.f32.mrf.mxu1 }
 0x14d   :  { %v338_v24 = vpop.f32.mrf.mxu0 }
 0x14f   :  { %v340_v4 = vpop.f32.mrf.mxu0 }
 0x151   :  { %v483_v26 = vpop.f32.mrf.mxu0 }
 0x152   :  { %v484_v52 = vadd.f32 %v483_v26, %v267_v23 }
 0x153   :  { %v485_v5 = vpop.f32.mrf.mxu0 }
 0x154   :  { %v486_v55 = vadd.f32 %v485_v5, %v269_v25  ;;  %v7757_v25 = vshrl.u32 %v2475_v0, 7 }
 0x155   :  { %v412_v9 = vpop.f32.mrf.mxu1 }
 0x156   :  { %v413_v47 = vadd.f32 %v412_v9, %v196_v1 }
 0x157   :  { %v414_v27 = vpop.f32.mrf.mxu1 }
 0x158   :  { %v415_v48 = vadd.f32 %v414_v27, %v198_v3 }
 0x15c   :  { %v554_v6 = vpop.f32.mrf.mxu1  ;;  %v677_v28 = vpop.f32.mrf.mxu0 }
 0x15d   :  { %v824_v51 = vadd.f32 %v677_v28, %v413_v47  ;;  %v555_v58 = vadd.f32 %v554_v6, %v338_v24 }
 0x15e   :  { %v556_v29 = vpop.f32.mrf.mxu1  ;;  %v679_v11 = vpop.f32.mrf.mxu0 }
 0x15f   :  { %v825_v53 = vadd.f32 %v679_v11, %v415_v48  ;;  %v557_v62 = vadd.f32 %v556_v29, %v340_v4 }
 0x160   :  { %v748_v12 = vpop.f32.mrf.mxu1 }
 0x161   :  { %v826_v59 = vadd.f32 %v748_v12, %v484_v52 }
 0x162   :  { %v750_v31 = vpop.f32.mrf.mxu1 }
 0x163   :  { %v827_v63 = vadd.f32 %v750_v31, %v486_v55 }
 0x168   :  { %v819_v30 = vpop.f32.mrf.mxu0 }
 0x169   :  { %v828_v15 = vadd.f32 %v819_v30, %v555_v58  ;;  %v2477_v30 = vsub.s32 0, %v7757_v25 }
 0x16a   :  { %v821_v13 = vpop.f32.mrf.mxu0 }
 0x16b   :  { %v829_v19 = vadd.f32 %v821_v13, %v557_v62 }
 0x174   :  { %v948_v32 = vpop.f32.mrf.mxu1 }
 0x175   :  { %v1095_v57 = vadd.f32 %v948_v32, %v824_v51  ;;  %v2489_v51 = vsub.s32 3, %v7757_v25 }
 0x176   :  { %v950_v14 = vpop.f32.mrf.mxu1 }
 0x177   :  { %v1096_v60 = vadd.f32 %v950_v14, %v825_v53  ;;  %v51_v14 = vld [vmem:[%s8459_s1] sm:$0x3f]  ;;  %s7285_s1 = smov 19  }
 0x178   :  { %v1019_v33 = vpop.f32.mrf.mxu0 }
 0x179   :  { %v1097_v16 = vadd.f32 %v1019_v33, %v826_v59  ;;  %v2460_v33 = vpop.permute.xlu0 %2459 }
 0x17a   :  { %v1021_v34 = vpop.f32.mrf.mxu0 }
 0x17b   :  { %v1098_v20 = vadd.f32 %v1021_v34, %v827_v63 }
 0x180   :  { %v1090_v35 = vpop.f32.mrf.mxu1 }
 0x181   :  { %v1099_v1 = vadd.f32 %v1090_v35, %v828_v15  ;;  %v7774_v15 = vrot.slane %v51_v14, %v2489_v51 }
 0x182   :  { %v1092_v37 = vpop.f32.mrf.mxu1 }
 0x183   :  { %v1100_v4 = vadd.f32 %v1092_v37, %v829_v19 }
 0x18b   :  { %v1219_v36 = vpop.f32.mrf.mxu0 }
 0x18c   :  { %v1366_v8 = vadd.f32 %v1219_v36, %v1095_v57 }
 0x18d   :  { %v1221_v38 = vpop.f32.mrf.mxu0 }
 0x18e   :  { %v1367_v17 = vadd.f32 %v1221_v38, %v1096_v60 }
 0x190   :  { %v1290_v39 = vpop.f32.mrf.mxu1 }
 0x191   :  { %v1368_v3 = vadd.f32 %v1290_v39, %v1097_v16  ;;  %v2481_v39 = vsub.s32 1, %v7757_v25  ;;  %v2497_v16 = vsub.s32 5, %v7757_v25 }
 0x192   :  { %v1292_v41 = vpop.f32.mrf.mxu1 }
 0x193   :  { %v1369_v9 = vadd.f32 %v1292_v41, %v1098_v20  ;;  %v7768_v55 = vrot.slane %v51_v14, %v2481_v39 }
 0x197   :  { %v1361_v40 = vpop.f32.mrf.mxu0 }
 0x198   :  { %v1370_v5 = vadd.f32 %v1361_v40, %v1099_v1 }
 0x199   :  { %v1363_v42 = vpop.f32.mrf.mxu0 }
 0x19a   :  { %v1371_v31 = vadd.f32 %v1363_v42, %v1100_v4  ;;  %v7765_v42 = vrot.slane %v51_v14, %v2477_v30 }
 0x1a3   :  { %v1490_v43 = vpop.f32.mrf.mxu1 }
 0x1a4   :  { %v1637_v2 = vadd.f32 %v1490_v43, %v1366_v8  ;;  %v2485_v43 = vsub.s32 2, %v7757_v25 }
 0x1a5   :  { %v1492_v45 = vpop.f32.mrf.mxu1 }
 0x1a6   :  { %v1638_v24 = vadd.f32 %v1492_v45, %v1367_v17  ;;  %v7770_v58 = vrot.slane %v51_v14, %v2485_v43 }
 0x1a8   :  { %v1561_v44 = vpop.f32.mrf.mxu0 }
 0x1a9   :  { %v1639_v6 = vadd.f32 %v1561_v44, %v1368_v3 }
 0x1aa   :  { %v1563_v46 = vpop.f32.mrf.mxu0 }
 0x1ab   :  { %v1640_v13 = vadd.f32 %v1563_v46, %v1369_v9  ;;  %v7784_v9 = vrot.slane %v51_v14, %v2497_v16 }
 0x1b0   :  { %v1632_v49 = vpop.f32.mrf.mxu1 }
 0x1b1   :  { %v1641_v36 = vadd.f32 %v1632_v49, %v1370_v5 }
 0x1b2   :  { %v1634_v54 = vpop.f32.mrf.mxu1 }
 0x1b3   :  { %v1642_v45 = vadd.f32 %v1634_v54, %v1371_v31  ;;  %v2493_v54 = vsub.s32 4, %v7757_v25 }
 0x1bc   :  { %v1761_v50 = vpop.f32.mrf.mxu0 }
 0x1bd   :  { %v1908_v26 = vadd.f32 %v1761_v50, %v1637_v2  ;;  %v7779_v2 = vrot.slane %v51_v14, %v2493_v54 }
 0x1be   :  { %v1763_v56 = vpop.f32.mrf.mxu0 }
 0x1bf   :  { %v1909_v29 = vadd.f32 %v1763_v56, %v1638_v24 }
 0x1c1   :  { %v1832_v61 = vpop.f32.mrf.mxu1 }
 0x1c2   :  { %v1910_v37 = vadd.f32 %v1832_v61, %v1639_v6 }
 0x1c3   :  { %v1834_v18 = vpop.f32.mrf.mxu1 }
 0x1c4   :  { %v1911_v46 = vadd.f32 %v1834_v18, %v1640_v13 }
 0x1c8   :  { %v1903_v7 = vpop.f32.mrf.mxu0 }
 0x1c9   :  { %v1912_v49 = vadd.f32 %v1903_v7, %v1641_v36 }
 0x1ca   :  { %v1905_v21 = vpop.f32.mrf.mxu0 }
 0x1cb   :  { %v1913_v61 = vadd.f32 %v1905_v21, %v1642_v45 }
 0x1d4   :  { %v2032_v22 = vpop.f32.mrf.mxu1 }
 0x1d5   :  { %v2179_v11 = vadd.f32 %v2032_v22, %v1908_v26 }
 0x1d6   :  { %v2034_v27 = vpop.f32.mrf.mxu1 }
 0x1d7   :  { %v2180_v34 = vadd.f32 %v2034_v27, %v1909_v29 }
 0x1d9   :  { %v2103_v23 = vpop.f32.mrf.mxu0 }
 0x1da   :  { %v2181_v47 = vadd.f32 %v2103_v23, %v1910_v37 }
 0x1db   :  { %v2105_v28 = vpop.f32.mrf.mxu0 }
 0x1dc   :  { %v2182_v53 = vadd.f32 %v2105_v28, %v1911_v46 }
 0x1e0   :  { %v2174_v12 = vpop.f32.mrf.mxu1 }
 0x1e1   :  { %v2183_v62 = vadd.f32 %v2174_v12, %v1912_v49 }
 0x1e2   :  { %v2176_v40 = vpop.f32.mrf.mxu1 }
 0x1e3   :  { %v2184_v17 = vadd.f32 %v2176_v40, %v1913_v61 }
 0x1ec   :  { %v2303_v32 = vpop.f32.mrf.mxu0 }
 0x1ed   :  { %v2450_v35 = vadd.f32 %v2303_v32, %v2179_v11 }
 0x1ee   :  { %v2305_v38 = vpop.f32.mrf.mxu0 }
 0x1ef   :  { %v2451_v41 = vadd.f32 %v2305_v38, %v2180_v34  ;;  %v2462_v44 = vadd.f32 %v2460_v33, %v2450_v35 }
 0x1f1   :  { %v2463_v48 = vadd.f32 %v2460_v33, %v2451_v41  ;;  %v2374_v50 = vpop.f32.mrf.mxu1  ;;  %v2468_v52 = vmax.f32 %v2462_v44, 0.0 }
 0x1f2   :  { %v2452_v56 = vadd.f32 %v2374_v50, %v2181_v47  ;;  %v7185_v50 = vld [vmem:[%s8460_s4 + $0x8] sm:$0xff] }
 0x1f3   :  { %v2469_v57 = vmax.f32 %v2463_v48, 0.0  ;;  %v2376_v59 = vpop.f32.mrf.mxu1  ;;  %v2505_v60 = vmul.f32 %v7765_v42, %v2468_v52 }
 0x1f4   :  { %v2464_v63 = vadd.f32 %v2460_v33, %v2452_v56  ;;  %v2453_v8 = vadd.f32 %v2376_v59, %v2182_v53 }
 0x1f5   :  { %2517 = vrot.lane.b32.xlu1 %v2505_v60, %s7285_s1  ;;  %v2445_v7 = vpop.f32.mrf.mxu0  ;;  %v2506_v20 = vmul.f32 %v7768_v55, %v2469_v57 }
 0x1f6   :  { %v2470_v18 = vmax.f32 %v2464_v63, 0.0  ;;  %v2465_v0 = vadd.f32 %v2460_v33, %v2453_v8  ;;  %v2454_v19 = vadd.f32 %v2445_v7, %v2183_v62 }
 0x1f7   :  { %v2447_v21 = vpop.f32.mrf.mxu0 }
 0x1f8   :  { %v2507_v22 = vmul.f32 %v7770_v58, %v2470_v18  ;;  %v2471_v1 = vmax.f32 %v2465_v0, 0.0  ;;  %v2466_v3 = vadd.f32 %v2460_v33, %v2454_v19  ;;  %v2455_v23 = vadd.f32 %v2447_v21, %v2184_v17 }
 0x1f9   :  { %2519 = vrot.lane.b32.xlu1 %v2506_v20, %s7285_s1  ;;  %v2555_v20 = vld [vmem:[%s8460_s4] sm:$0xff] }
 0x1fa   :  { %v2508_v24 = vmul.f32 %v7774_v15, %v2471_v1  ;;  %v2472_v4 = vmax.f32 %v2466_v3, 0.0  ;;  %v2467_v25 = vadd.f32 %v2460_v33, %v2455_v23  ;;  %2521 = vrot.lane.b32.xlu0 %v2507_v22, %s7285_s1 }
 0x1fc   :  { %v2509_v26 = vmul.f32 %v7779_v2, %v2472_v4  ;;  %v2473_v27 = vmax.f32 %v2467_v25, 0.0 }
 0x1fd   :  { %2523 = vrot.lane.b32.xlu1 %v2508_v24, %s7285_s1  ;;  %v7192_v24 = vld [vmem:[%s8460_s4 + $0x10] sm:$0xff] }
 0x1fe   :  { %v2510_v5 = vmul.f32 %v7784_v9, %v2473_v27  ;;  %2525 = vrot.lane.b32.xlu0 %v2509_v26, %s7285_s1 }
 0x201   :  { %2527 = vrot.lane.b32.xlu1 %v2510_v5, %s7285_s1 }
 0x267   :  { %v2518_v6 = vpop.permute.xlu1 %2517 }
 0x268   :  { %2542 = vst.msk [vmem:[#allocation2] sm:$0xff] %vm2541_vm10, %v2518_v6 }
 0x26b   :  { %v2520_v28 = vpop.permute.xlu1 %2519 }
 0x26c   :  { %v2522_v29 = vpop.permute.xlu0 %2521  ;;  %v7822_v14 = vsel %vm2529_vm11, %v2518_v6, %v2520_v28 }
 0x26d   :  { %v7794_v11 = vsel %vm2529_vm11, %v2520_v28, %v2522_v29 }
 0x26e   :  { %2568 = vrot.lane.b32.xlu1 %v7794_v11, %s7275_s30 }
 0x26f   :  { %v2524_v12 = vpop.permute.xlu1 %2523  ;;  %v7798_v30 = vld [vmem:[#allocation2] sm:$0xff] }
 0x270   :  { %v7801_v31 = vsel %vm2529_vm11, %v2522_v29, %v2524_v12  ;;  %2564 = vrot.lane.b32.xlu0 %v7798_v30, %s7275_s30  ;;  %v2526_v13 = vpop.permute.xlu0 %2525 }
 0x271   :  { %v7839_v34 = vsel %vm2529_vm11, %v2524_v12, %v2526_v13 }
 0x272   :  { %2570 = vrot.lane.b32.xlu1 %v7801_v31, %s7275_s30 }
 0x273   :  { %v2528_v32 = vpop.permute.xlu1 %2527 }
 0x274   :  { %v2534_v33 = vsel %vm2529_vm11, %v2526_v13, %v2528_v32  ;;  %3022 = vrot.lane.b32.xlu0 %v7798_v30, %s7277_s26 }
 0x275   :  { %2548 = vst.msk [vmem:[#allocation2 + $0x28] sm:$0xff] %vm2547_vm12, %v2534_v33 }
 0x276   :  { %3026 = vrot.lane.b32.xlu1 %v7794_v11, %s7277_s26 }
 0x278   :  { %3269 = vrot.lane.b32.xlu0 %v7798_v30, %s7278_s0 }
 0x27a   :  { %3028 = vrot.lane.b32.xlu1 %v7801_v31, %s7277_s26 }
 0x27c   :  { %3516 = vrot.lane.b32.xlu0 %v7798_v30, %s7279_s27  ;;  %v7849_v35 = vld [vmem:[#allocation2 + $0x28] sm:$0xff] }
 0x27e   :  { %3273 = vrot.lane.b32.xlu1 %v7794_v11, %s7278_s0 }
 0x280   :  { %2566 = vrot.lane.b32.xlu0 %v7822_v14, %s7275_s30 }
 0x282   :  { %3518 = vrot.lane.b32.xlu1 %v7822_v14, %s7279_s27 }
 0x284   :  { %3024 = vrot.lane.b32.xlu0 %v7822_v14, %s7277_s26 }
 0x286   :  { %3522 = vrot.lane.b32.xlu1 %v7801_v31, %s7279_s27 }
 0x288   :  { %3271 = vrot.lane.b32.xlu0 %v7822_v14, %s7278_s0 }
 0x28a   :  { %3767 = vrot.lane.b32.xlu1 %v7794_v11, %s7280_s28 }
 0x28c   :  { %3275 = vrot.lane.b32.xlu0 %v7801_v31, %s7278_s0 }
 0x28e   :  { %3277 = vrot.lane.b32.xlu1 %v7839_v34, %s7278_s0 }
 0x290   :  { %3520 = vrot.lane.b32.xlu0 %v7794_v11, %s7279_s27 }
 0x292   :  { %3771 = vrot.lane.b32.xlu1 %v7839_v34, %s7280_s28 }
 0x294   :  { %3765 = vrot.lane.b32.xlu0 %v7822_v14, %s7280_s28 }
 0x296   :  { %2574 = vrot.lane.b32.xlu1 %v7849_v35, %s7275_s30 }
 0x298   :  { %3769 = vrot.lane.b32.xlu0 %v7801_v31, %s7280_s28 }
 0x29a   :  { %4012 = vrot.lane.b32.xlu1 %v7822_v14, %s7281_s29 }
 0x29c   :  { %2572 = vrot.lane.b32.xlu0 %v7839_v34, %s7275_s30 }
 0x29e   :  { %4016 = vrot.lane.b32.xlu1 %v7801_v31, %s7281_s29 }
 0x2a0   :  { %3763 = vrot.lane.b32.xlu0 %v7798_v30, %s7280_s28 }
 0x2a2   :  { %3032 = vrot.lane.b32.xlu1 %v7849_v35, %s7277_s26 }
 0x2a4   :  { %3030 = vrot.lane.b32.xlu0 %v7839_v34, %s7277_s26 }
 0x2a6   :  { %4261 = vrot.lane.b32.xlu1 %v7794_v11, %s7282_s12 }
 0x2a8   :  { %3524 = vrot.lane.b32.xlu0 %v7839_v34, %s7279_s27 }
 0x2aa   :  { %3279 = vrot.lane.b32.xlu1 %v7849_v35, %s7278_s0 }
 0x2ac   :  { %4014 = vrot.lane.b32.xlu0 %v7794_v11, %s7281_s29 }
 0x2ae   :  { %3526 = vrot.lane.b32.xlu1 %v7849_v35, %s7279_s27 }
 0x2b0   :  { %4010 = vrot.lane.b32.xlu0 %v7798_v30, %s7281_s29 }
 0x2b2   :  { %4265 = vrot.lane.b32.xlu1 %v7839_v34, %s7282_s12 }
 0x2b4   :  { %4018 = vrot.lane.b32.xlu0 %v7839_v34, %s7281_s29 }
 0x2b6   :  { %3773 = vrot.lane.b32.xlu1 %v7849_v35, %s7280_s28 }
 0x2b8   :  { %4259 = vrot.lane.b32.xlu0 %v7822_v14, %s7282_s12 }
 0x2ba   :  { %4020 = vrot.lane.b32.xlu1 %v7849_v35, %s7281_s29 }
 0x2bc   :  { %4263 = vrot.lane.b32.xlu0 %v7801_v31, %s7282_s12 }
 0x2be   :  { %4506 = vrot.lane.b32.xlu1 %v7822_v14, %s7283_s15 }
 0x2c0   :  { %4257 = vrot.lane.b32.xlu0 %v7798_v30, %s7282_s12 }
 0x2c2   :  { %4267 = vrot.lane.b32.xlu1 %v7849_v35, %s7282_s12 }
 0x2c4   :  { %4508 = vrot.lane.b32.xlu0 %v7794_v11, %s7283_s15 }
 0x2c6   :  { %4510 = vrot.lane.b32.xlu1 %v7801_v31, %s7283_s15 }
 0x2c8   :  { %4504 = vrot.lane.b32.xlu0 %v7798_v30, %s7283_s15 }
 0x2ca   :  { %4514 = vrot.lane.b32.xlu1 %v7849_v35, %s7283_s15 }
 0x2cc   :  { %4512 = vrot.lane.b32.xlu0 %v7839_v34, %s7283_s15 }
 0x2e0   :  { %v2569_v36 = vpop.permute.xlu1 %2568 }
 0x2e2   :  { %v2565_v37 = vpop.permute.xlu0 %2564 }
 0x2e4   :  { %v2571_v38 = vpop.permute.xlu1 %2570 }
 0x2e5   :  { %v2578_v18 = vsel %vm103_vm1, %v2569_v36, %v2571_v38 }
 0x2e6   :  { %v3023_v39 = vpop.permute.xlu0 %3022 }
 0x2e8   :  { %v7907_v40 = vpop.permute.xlu1 %3026 }
 0x2ea   :  { %v7909_v41 = vpop.permute.xlu0 %3269 }
 0x2ec   :  { %v7911_v43 = vpop.permute.xlu1 %3028 }
 0x2ed   :  { %v3036_v26 = vsel %vm585_vm3, %v7907_v40, %v7911_v43 }
 0x2ee   :  { %v7913_v44 = vpop.permute.xlu0 %3516 }
 0x2f0   :  { %v7915_v45 = vpop.permute.xlu1 %3273 }
 0x2f2   :  { %v2567_v46 = vpop.permute.xlu0 %2566 }
 0x2f3   :  { %v2577_v47 = vsel %vm103_vm1, %v2567_v46, %v2569_v36  ;;  %v2576_v48 = vsel %vm103_vm1, %v2565_v37, %v2567_v46 }
 0x2f4   :  { %2621 = vmatprep.subr.mxu1 %v2577_v47  ;;  %v7922_v51 = vpop.permute.xlu1 %3518  ;;  %v7204_v47 = vld [vmem:[%s8460_s4 + $0x28] sm:$0xff] }
 0x2f5   :  { %2622 = vmatpush1.msra.mxu1 %v2576_v48 }
 0x2f6   :  { %v3025_v52 = vpop.permute.xlu0 %3024  ;;  %7186 = vmatmul.mubr.msk.f32.vlgmr.msra.gmra.mxu1 %vm2587_vm13, %v7185_v50 }
 0x2f7   :  { %2797 = vmatprep.mubr.f32.mxu1 %v7276_v10  ;;  %v3035_v21 = vsel %vm585_vm3, %v3025_v52, %v7907_v40  ;;  %v3034_v3 = vsel %vm585_vm3, %v3023_v39, %v3025_v52 }
 0x2f8   :  { %v7926_v49 = vpop.permute.xlu1 %3522 }
 0x2fa   :  { %v3272_v53 = vpop.permute.xlu0 %3271 }
 0x2fb   :  { %v3282_v5 = vsel %vm856_vm4, %v3272_v53, %v7915_v45  ;;  %v3281_v29 = vsel %vm856_vm4, %v7909_v41, %v3272_v53  ;;  %v7208_v53 = vld [vmem:[%s8460_s4 + $0x30] sm:$0xff] }
 0x2fc   :  { %v7928_v56 = vpop.permute.xlu1 %3767 }
 0x2fe   :  { %v3276_v57 = vpop.permute.xlu0 %3275 }
 0x2ff   :  { %v3283_v12 = vsel %vm856_vm4, %v7915_v45, %v3276_v57 }
 0x300   :  { %v7930_v59 = vpop.permute.xlu1 %3277 }
 0x301   :  { %v3284_v28 = vsel %vm856_vm4, %v3276_v57, %v7930_v59 }
 0x302   :  { %v7932_v60 = vpop.permute.xlu0 %3520 }
 0x303   :  { %v3530_v37 = vsel %vm1127_vm5, %v7932_v60, %v7926_v49 }
 0x304   :  { %v7934_v54 = vpop.permute.xlu1 %3771 }
 0x306   :  { %v7936_v61 = vpop.permute.xlu0 %3765 }
 0x307   :  { %v3776_v39 = vsel %vm1398_vm6, %v7936_v61, %v7928_v56 }
 0x308   :  { %v2575_v62 = vpop.permute.xlu1 %2574 }
 0x309   :  { %2763 = vmatprep.subr.mxu1 %v2575_v62 }
 0x30a   :  { %v7938_v63 = vpop.permute.xlu0 %3769 }
 0x30b   :  { %v3777_v46 = vsel %vm1398_vm6, %v7928_v56, %v7938_v63 }
 0x30c   :  { %v7940_v8 = vpop.permute.xlu1 %4012 }
 0x30e   :  { %v2573_v7 = vpop.permute.xlu0 %2572 }
 0x30f   :  { %v2579_v16 = vsel %vm103_vm1, %v2571_v38, %v2573_v7  ;;  %v2580_v17 = vsel %vm103_vm1, %v2573_v7, %v2575_v62 }
 0x310   :  { %2692 = vmatprep.subr.mxu0 %v2579_v16  ;;  %2764 = vmatpush1.msra.mxu1 %v2580_v17  ;;  %v7945_v0 = vpop.permute.xlu1 %4016 }
 0x311   :  { %2693 = vmatpush1.msra.mxu0 %v2578_v18  ;;  %7188 = vmatmul.mubr.msk.f32.vlgmr.msra.gmra.mxu1 %vm2587_vm13, %v7185_v50  ;;  %v7212_v18 = vld [vmem:[%s8460_s4 + $0x38] sm:$0xff] }
 0x312   :  { %v7948_v19 = vpop.permute.xlu0 %3763  ;;  %7187 = vmatmul.mubr.msk.f32.vlgmr.msra.gmra.mxu0 %vm2587_vm13, %v7185_v50  ;;  %2837 = vmatprep.subr.mxu0 %v7822_v14  ;;  %v3528_v14 = vsel %vm1127_vm5, %v7913_v44, %v7922_v51 }
 0x313   :  { %2838 = vmatpush1.msra.mxu0 %v7798_v30  ;;  %2908 = vmatprep.subr.mxu1 %v7801_v31  ;;  %v7196_v30 = vld [vmem:[%s8460_s4 + $0x18] sm:$0xff]  ;;  %v3529_v31 = vsel %vm1127_vm5, %v7922_v51, %v7932_v60  ;;  %v3775_v44 = vsel %vm1398_vm6, %v7948_v19, %v7936_v61 }
 0x314   :  { %2909 = vmatpush1.msra.mxu1 %v7794_v11  ;;  %2979 = vmatprep.subr.mxu0 %v7849_v35  ;;  %v3033_v22 = vpop.permute.xlu1 %3032 }
 0x315   :  { %2871 = vmatprep.mubr.f32.mxu0 %v7276_v10  ;;  %3078 = vmatprep.subr.mxu1 %v3035_v21 }
 0x316   :  { %v3031_v1 = vpop.permute.xlu0 %3030  ;;  %7189 = vmatmul.mubr.msk.f32.vlgmr.msra.gmra.mxu0 %vm2587_vm13, %v2555_v20  ;;  %2942 = vmatprep.mubr.f32.mxu1 %v7276_v10 }
 0x317   :  { %2980 = vmatpush1.msra.mxu0 %v7839_v34  ;;  %7190 = vmatmul.mubr.msk.f32.vlgmr.msra.gmra.mxu1 %vm2587_vm13, %v2555_v20  ;;  %v3037_v23 = vsel %vm585_vm3, %v7911_v43, %v3031_v1  ;;  %v3038_v27 = vsel %vm585_vm3, %v3031_v1, %v3033_v22  ;;  %v7200_v34 = vld [vmem:[%s8460_s4 + $0x20] sm:$0xff]  ;;  %v3778_v43 = vsel %vm1398_vm6, %v7938_v63, %v7934_v54 }
 0x318   :  { %3079 = vmatpush1.msra.mxu1 %v3034_v3  ;;  %3149 = vmatprep.subr.mxu0 %v3037_v23  ;;  %v7972_v4 = vpop.permute.xlu1 %4261 }
 0x319   :  { %3013 = vmatprep.mubr.f32.mxu0 %v7276_v10  ;;  %3112 = vmatprep.mubr.f32.mxu1 %v7276_v10 }
 0x31a   :  { %v3525_v25 = vpop.permute.xlu0 %3524  ;;  %7191 = vmatmul.mubr.msk.f32.vlgmr.msra.gmra.mxu0 %vm2587_vm13, %v2555_v20  ;;  %3220 = vmatprep.subr.mxu1 %v3033_v22  ;;  %v7216_v22 = vld [vmem:[%s8460_s4 + $0x40] sm:$0xff] }
 0x31b   :  { %3150 = vmatpush1.msra.mxu0 %v3036_v26  ;;  %7193 = vmatmul.mubr.msk.f32.vlgmr.msra.gmra.mxu1 %vm2587_vm13, %v7192_v24  ;;  %v3531_v35 = vsel %vm1127_vm5, %v7926_v49, %v3525_v25 }
 0x31c   :  { %3325 = vmatprep.subr.mxu0 %v3282_v5  ;;  %3183 = vmatprep.mubr.f32.mxu0 %v7276_v10  ;;  %v3280_v6 = vpop.permute.xlu1 %3279 }
 0x31d   :  { %3221 = vmatpush1.msra.mxu1 %v3038_v27  ;;  %3254 = vmatprep.mubr.f32.mxu1 %v7276_v10  ;;  %v3285_v33 = vsel %vm856_vm4, %v7930_v59, %v3280_v6 }
 0x31e   :  { %v7990_v11 = vpop.permute.xlu0 %4014  ;;  %7194 = vmatmul.mubr.msk.f32.vlgmr.msra.gmra.mxu0 %vm2587_vm13, %v7192_v24  ;;  %3396 = vmatprep.subr.mxu1 %v3284_v28 }
 0x31f   :  { %3326 = vmatpush1.msra.mxu0 %v3281_v29  ;;  %7195 = vmatmul.mubr.msk.f32.vlgmr.msra.gmra.mxu1 %vm2587_vm13, %v7192_v24  ;;  %v4023_v48 = vsel %vm1669_vm7, %v7940_v8, %v7990_v11  ;;  %v4024_v59 = vsel %vm1669_vm7, %v7990_v11, %v7945_v0 }
 0x320   :  { %3397 = vmatpush1.msra.mxu1 %v3283_v12  ;;  %3359 = vmatprep.mubr.f32.mxu0 %v7276_v10  ;;  %v3527_v13 = vpop.permute.xlu1 %3526 }
 0x321   :  { %3572 = vmatprep.subr.mxu1 %v3529_v31  ;;  %3430 = vmatprep.mubr.f32.mxu1 %v7276_v10  ;;  %v3532_v40 = vsel %vm1127_vm5, %v3525_v25, %v3527_v13 }
 0x322   :  { %v4011_v32 = vpop.permute.xlu0 %4010  ;;  %7197 = vmatmul.mubr.msk.f32.vlgmr.msra.gmra.mxu0 %vm2587_vm13, %v7196_v30  ;;  %3467 = vmatprep.subr.mxu0 %v3280_v6 }
 0x323   :  { %7198 = vmatmul.mubr.msk.f32.vlgmr.msra.gmra.mxu1 %vm2587_vm13, %v7196_v30  ;;  %3468 = vmatpush1.msra.mxu0 %v3285_v33  ;;  %v4022_v49 = vsel %vm1669_vm7, %v4011_v32, %v7940_v8 }
 0x324   :  { %3573 = vmatpush1.msra.mxu1 %v3528_v14  ;;  %3501 = vmatprep.mubr.f32.mxu0 %v7276_v10  ;;  %v8017_v36 = vpop.permute.xlu1 %4265 }
 0x325   :  { %3606 = vmatprep.mubr.f32.mxu1 %v7276_v10  ;;  %3643 = vmatprep.subr.mxu0 %v3531_v35 }
 0x326   :  { %v4019_v38 = vpop.permute.xlu0 %4018  ;;  %7199 = vmatmul.mubr.msk.f32.vlgmr.msra.gmra.mxu0 %vm2587_vm13, %v7196_v30  ;;  %3714 = vmatprep.subr.mxu1 %v3527_v13 }
 0x327   :  { %7201 = vmatmul.mubr.msk.f32.vlgmr.msra.gmra.mxu1 %vm2587_vm13, %v7200_v34  ;;  %3644 = vmatpush1.msra.mxu0 %v3530_v37  ;;  %v4025_v56 = vsel %vm1669_vm7, %v7945_v0, %v4019_v38 }
 0x328   :  { %3819 = vmatprep.subr.mxu0 %v3776_v39  ;;  %3677 = vmatprep.mubr.f32.mxu0 %v7276_v10  ;;  %v3774_v41 = vpop.permute.xlu1 %3773 }
 0x329   :  { %3715 = vmatpush1.msra.mxu1 %v3532_v40  ;;  %3748 = vmatprep.mubr.f32.mxu1 %v7276_v10  ;;  %v3779_v52 = vsel %vm1398_vm6, %v7934_v54, %v3774_v41 }
 0x32a   :  { %v4260_v45 = vpop.permute.xlu0 %4259  ;;  %7202 = vmatmul.mubr.msk.f32.vlgmr.msra.gmra.mxu0 %vm2587_vm13, %v7200_v34  ;;  %3890 = vmatprep.subr.mxu1 %v3778_v43 }
 0x32b   :  { %7203 = vmatmul.mubr.msk.f32.vlgmr.msra.gmra.mxu1 %vm2587_vm13, %v7200_v34  ;;  %3820 = vmatpush1.msra.mxu0 %v3775_v44  ;;  %v4270_v54 = vsel %vm1940_vm8, %v4260_v45, %v7972_v4 }
 0x32c   :  { %3891 = vmatpush1.msra.mxu1 %v3777_v46  ;;  %3853 = vmatprep.mubr.f32.mxu0 %v7276_v10  ;;  %v4021_v50 = vpop.permute.xlu1 %4020 }
 0x32d   :  { %4066 = vmatprep.subr.mxu1 %v4023_v48  ;;  %3924 = vmatprep.mubr.f32.mxu1 %v7276_v10  ;;  %v4026_v61 = vsel %vm1669_vm7, %v4019_v38, %v4021_v50 }
 0x32e   :  { %v4264_v51 = vpop.permute.xlu0 %4263  ;;  %7205 = vmatmul.mubr.msk.f32.vlgmr.msra.gmra.mxu0 %vm2587_vm13, %v7204_v47  ;;  %3961 = vmatprep.subr.mxu0 %v3774_v41 }
 0x32f   :  { %7206 = vmatmul.mubr.msk.f32.vlgmr.msra.gmra.mxu1 %vm2587_vm13, %v7204_v47  ;;  %3962 = vmatpush1.msra.mxu0 %v3779_v52  ;;  %v4272_v63 = vsel %vm1940_vm8, %v4264_v51, %v8017_v36  ;;  %v4271_v16 = vsel %vm1940_vm8, %v7972_v4, %v4264_v51 }
 0x330   :  { %4067 = vmatpush1.msra.mxu1 %v4022_v49  ;;  %3995 = vmatprep.mubr.f32.mxu0 %v7276_v10  ;;  %v4507_v57 = vpop.permute.xlu1 %4506 }
 0x331   :  { %4100 = vmatprep.mubr.f32.mxu1 %v7276_v10  ;;  %4137 = vmatprep.subr.mxu0 %v4025_v56 }
 0x332   :  { %v4258_v60 = vpop.permute.xlu0 %4257  ;;  %7207 = vmatmul.mubr.msk.f32.vlgmr.msra.gmra.mxu0 %vm2587_vm13, %v7204_v47  ;;  %4208 = vmatprep.subr.mxu1 %v4021_v50 }
 0x333   :  { %7209 = vmatmul.mubr.msk.f32.vlgmr.msra.gmra.mxu1 %vm2587_vm13, %v7208_v53  ;;  %4138 = vmatpush1.msra.mxu0 %v4024_v59  ;;  %v4269_v8 = vsel %vm1940_vm8, %v4258_v60, %v4260_v45 }
 0x334   :  { %4313 = vmatprep.subr.mxu0 %v4270_v54  ;;  %4171 = vmatprep.mubr.f32.mxu0 %v7276_v10  ;;  %v4268_v62 = vpop.permute.xlu1 %4267 }
 0x335   :  { %4209 = vmatpush1.msra.mxu1 %v4026_v61  ;;  %4242 = vmatprep.mubr.f32.mxu1 %v7276_v10  ;;  %v4273_v20 = vsel %vm1940_vm8, %v8017_v36, %v4268_v62 }
 0x336   :  { %v4509_v7 = vpop.permute.xlu0 %4508  ;;  %7210 = vmatmul.mubr.msk.f32.vlgmr.msra.gmra.mxu0 %vm2587_vm13, %v7208_v53  ;;  %4384 = vmatprep.subr.mxu1 %v4272_v63 }
 0x337   :  { %7211 = vmatmul.mubr.msk.f32.vlgmr.msra.gmra.mxu1 %vm2587_vm13, %v7208_v53  ;;  %4314 = vmatpush1.msra.mxu0 %v4269_v8  ;;  %v4517_v17 = vsel %vm2211_vm9, %v4507_v57, %v4509_v7 }
 0x338   :  { %4385 = vmatpush1.msra.mxu1 %v4271_v16  ;;  %4347 = vmatprep.mubr.f32.mxu0 %v7276_v10  ;;  %v4511_v0 = vpop.permute.xlu1 %4510 }
 0x339   :  { %4418 = vmatprep.mubr.f32.mxu1 %v7276_v10  ;;  %4560 = vmatprep.subr.mxu1 %v4517_v17  ;;  %v4518_v4 = vsel %vm2211_vm9, %v4509_v7, %v4511_v0 }
 0x33a   :  { %v4505_v19 = vpop.permute.xlu0 %4504  ;;  %7213 = vmatmul.mubr.msk.f32.vlgmr.msra.gmra.mxu0 %vm2587_vm13, %v7212_v18  ;;  %4455 = vmatprep.subr.mxu0 %v4268_v62 }
 0x33b   :  { %v4516_v21 = vsel %vm2211_vm9, %v4505_v19, %v4507_v57  ;;  %7214 = vmatmul.mubr.msk.f32.vlgmr.msra.gmra.mxu1 %vm2587_vm13, %v7212_v18  ;;  %4456 = vmatpush1.msra.mxu0 %v4273_v20 }
 0x33c   :  { %4561 = vmatpush1.msra.mxu1 %v4516_v21  ;;  %4489 = vmatprep.mubr.f32.mxu0 %v7276_v10  ;;  %v4515_v1 = vpop.permute.xlu1 %4514 }
 0x33d   :  { %4594 = vmatprep.mubr.f32.mxu1 %v7276_v10  ;;  %4702 = vmatprep.subr.mxu1 %v4515_v1 }
 0x33e   :  { %v4513_v3 = vpop.permute.xlu0 %4512  ;;  %7215 = vmatmul.mubr.msk.f32.vlgmr.msra.gmra.mxu0 %vm2587_vm13, %v7212_v18 }
 0x33f   :  { %7217 = vmatmul.mubr.msk.f32.vlgmr.msra.gmra.mxu1 %vm2587_vm13, %v7216_v22  ;;  %v4519_v23 = vsel %vm2211_vm9, %v4511_v0, %v4513_v3  ;;  %4665 = vmatprep.mubr.f32.mxu0 %v7276_v10  ;;  %v4520_v24 = vsel %vm2211_vm9, %v4513_v3, %v4515_v1 }
 0x340   :  { %4631 = vmatprep.subr.mxu0 %v4519_v23  ;;  %4703 = vmatpush1.msra.mxu1 %v4520_v24 }
 0x341   :  { %4632 = vmatpush1.msra.mxu0 %v4518_v4  ;;  %4736 = vmatprep.mubr.f32.mxu1 %v7276_v10 }
 0x342   :  { %7218 = vmatmul.mubr.msk.f32.vlgmr.msra.gmra.mxu0 %vm2587_vm13, %v7216_v22 }
 0x343   :  { %7219 = vmatmul.mubr.msk.f32.vlgmr.msra.gmra.mxu1 %vm2587_vm13, %v7216_v22  ;;  %4967 = vmatprep.mubr.f32.mxu0 %v7276_v10 }
 0x344   :  { %5038 = vmatprep.mubr.f32.mxu1 %v7276_v10 }
 0x3b6   :  { %v2657_v25 = vpop.f32.mrf.mxu1 }
 0x3b8   :  { %v2659_v26 = vpop.f32.mrf.mxu1 }
 0x3d1   :  { %v2799_v27 = vpop.f32.mrf.mxu1 }
 0x3d2   :  { %v2728_v5 = vpop.f32.mrf.mxu0 }
 0x3d3   :  { %v2801_v6 = vpop.f32.mrf.mxu1 }
 0x3d4   :  { %v2730_v28 = vpop.f32.mrf.mxu0 }
 0x3d6   :  { %v2873_v29 = vpop.f32.mrf.mxu0 }
 0x3d7   :  { %v2944_v11 = vpop.f32.mrf.mxu1  ;;  %v2874_v46 = vadd.f32 %v2873_v29, %v2657_v25 }
 0x3d8   :  { %v2875_v12 = vpop.f32.mrf.mxu0  ;;  %v2945_v57 = vadd.f32 %v2944_v11, %v2728_v5 }
 0x3d9   :  { %v2946_v30 = vpop.f32.mrf.mxu1  ;;  %v2876_v50 = vadd.f32 %v2875_v12, %v2659_v26 }
 0x3da   :  { %v3015_v31 = vpop.f32.mrf.mxu0  ;;  %v2947_v63 = vadd.f32 %v2946_v30, %v2730_v28 }
 0x3db   :  { %v3114_v13 = vpop.f32.mrf.mxu1  ;;  %v3016_v49 = vadd.f32 %v3015_v31, %v2799_v27 }
 0x3dc   :  { %v3017_v32 = vpop.f32.mrf.mxu0  ;;  %v3261_v53 = vadd.f32 %v3114_v13, %v2874_v46 }
 0x3dd   :  { %v3116_v33 = vpop.f32.mrf.mxu1  ;;  %v3018_v60 = vadd.f32 %v3017_v32, %v2801_v6 }
 0x3de   :  { %v3185_v14 = vpop.f32.mrf.mxu0  ;;  %v3262_v54 = vadd.f32 %v3116_v33, %v2876_v50 }
 0x3df   :  { %v3256_v34 = vpop.f32.mrf.mxu1  ;;  %v3263_v8 = vadd.f32 %v3185_v14, %v2945_v57 }
 0x3e0   :  { %v3187_v35 = vpop.f32.mrf.mxu0  ;;  %v3265_v16 = vadd.f32 %v3256_v34, %v3016_v49 }
 0x3e1   :  { %v3258_v36 = vpop.f32.mrf.mxu1  ;;  %v3264_v0 = vadd.f32 %v3187_v35, %v2947_v63 }
 0x3e2   :  { %v3361_v37 = vpop.f32.mrf.mxu0  ;;  %v3266_v20 = vadd.f32 %v3258_v36, %v3018_v60 }
 0x3e3   :  { %v3432_v38 = vpop.f32.mrf.mxu1  ;;  %v3508_v61 = vadd.f32 %v3361_v37, %v3261_v53 }
 0x3e4   :  { %v3363_v39 = vpop.f32.mrf.mxu0  ;;  %v3510_v3 = vadd.f32 %v3432_v38, %v3263_v8 }
 0x3e5   :  { %v3434_v40 = vpop.f32.mrf.mxu1  ;;  %v3509_v17 = vadd.f32 %v3363_v39, %v3262_v54 }
 0x3e6   :  { %v3503_v41 = vpop.f32.mrf.mxu0  ;;  %v3511_v27 = vadd.f32 %v3434_v40, %v3264_v0 }
 0x3e7   :  { %v3608_v43 = vpop.f32.mrf.mxu1  ;;  %v3512_v21 = vadd.f32 %v3503_v41, %v3265_v16 }
 0x3e8   :  { %v3505_v44 = vpop.f32.mrf.mxu0  ;;  %v3755_v22 = vadd.f32 %v3608_v43, %v3508_v61 }
 0x3e9   :  { %v3610_v45 = vpop.f32.mrf.mxu1  ;;  %v3513_v24 = vadd.f32 %v3505_v44, %v3266_v20 }
 0x3ea   :  { %v3679_v47 = vpop.f32.mrf.mxu0  ;;  %v3756_v4 = vadd.f32 %v3610_v45, %v3509_v17 }
 0x3eb   :  { %v3750_v48 = vpop.f32.mrf.mxu1  ;;  %v3757_v5 = vadd.f32 %v3679_v47, %v3510_v3 }
 0x3ec   :  { %v3681_v51 = vpop.f32.mrf.mxu0  ;;  %v3759_v28 = vadd.f32 %v3750_v48, %v3512_v21 }
 0x3ed   :  { %v3752_v52 = vpop.f32.mrf.mxu1  ;;  %v3758_v12 = vadd.f32 %v3681_v51, %v3511_v27 }
 0x3ee   :  { %v3855_v56 = vpop.f32.mrf.mxu0  ;;  %v3760_v31 = vadd.f32 %v3752_v52, %v3513_v24 }
 0x3ef   :  { %v3926_v59 = vpop.f32.mrf.mxu1  ;;  %v4002_v25 = vadd.f32 %v3855_v56, %v3755_v22 }
 0x3f0   :  { %v3857_v62 = vpop.f32.mrf.mxu0  ;;  %v4004_v14 = vadd.f32 %v3926_v59, %v3757_v5 }
 0x3f1   :  { %v3928_v7 = vpop.f32.mrf.mxu1  ;;  %v4003_v29 = vadd.f32 %v3857_v62, %v3756_v4 }
 0x3f2   :  { %v3997_v18 = vpop.f32.mrf.mxu0  ;;  %v4005_v39 = vadd.f32 %v3928_v7, %v3758_v12 }
 0x3f3   :  { %v4102_v19 = vpop.f32.mrf.mxu1  ;;  %v4006_v13 = vadd.f32 %v3997_v18, %v3759_v28 }
 0x3f4   :  { %v3999_v1 = vpop.f32.mrf.mxu0  ;;  %v4249_v32 = vadd.f32 %v4102_v19, %v4002_v25 }
 0x3f5   :  { %v4104_v23 = vpop.f32.mrf.mxu1  ;;  %v4007_v35 = vadd.f32 %v3999_v1, %v3760_v31 }
 0x3f6   :  { %v4173_v26 = vpop.f32.mrf.mxu0  ;;  %v4250_v36 = vadd.f32 %v4104_v23, %v4003_v29 }
 0x3f7   :  { %v4244_v6 = vpop.f32.mrf.mxu1  ;;  %v4251_v41 = vadd.f32 %v4173_v26, %v4004_v14 }
 0x3f8   :  { %v4175_v11 = vpop.f32.mrf.mxu0  ;;  %v4253_v43 = vadd.f32 %v4244_v6, %v4006_v13 }
 0x3f9   :  { %v4246_v30 = vpop.f32.mrf.mxu1  ;;  %v4252_v46 = vadd.f32 %v4175_v11, %v4005_v39  ;;  %v4789_v39 = vld [vmem:[%s8462_s5] sm:$0xff] }
 0x3fa   :  { %v4349_v33 = vpop.f32.mrf.mxu0  ;;  %v4254_v48 = vadd.f32 %v4246_v30, %v4007_v35 }
 0x3fb   :  { %v4420_v34 = vpop.f32.mrf.mxu1  ;;  %v4496_v37 = vadd.f32 %v4349_v33, %v4249_v32  ;;  %v4802_v32 = vld [vmem:[%s8461_s6] sm:$0xff] }
 0x3fc   :  { %v4351_v38 = vpop.f32.mrf.mxu0  ;;  %v4498_v49 = vadd.f32 %v4420_v34, %v4251_v41 }
 0x3fd   :  { %v4422_v40 = vpop.f32.mrf.mxu1  ;;  %v4497_v44 = vadd.f32 %v4351_v38, %v4250_v36 }
 0x3fe   :  { %v4491_v45 = vpop.f32.mrf.mxu0  ;;  %v4499_v54 = vadd.f32 %v4422_v40, %v4252_v46 }
 0x3ff   :  { %v4596_v47 = vpop.f32.mrf.mxu1  ;;  %v4500_v50 = vadd.f32 %v4491_v45, %v4253_v43 }
 0x400   :  { %v8107_v51 = vadd.f32 %v4596_v47, %v4496_v37  ;;  %v4493_v52 = vpop.f32.mrf.mxu0 }
 0x401   :  { %v4598_v53 = vpop.f32.mrf.mxu1  ;;  %v4501_v57 = vadd.f32 %v4493_v52, %v4254_v48 }
 0x402   :  { %v4749_v56 = vmul.f32 %v8107_v51, %v7765_v42  ;;  %v4744_v59 = vadd.f32 %v4598_v53, %v4497_v44  ;;  %v4667_v60 = vpop.f32.mrf.mxu0 }
 0x403   :  { %v4745_v61 = vadd.f32 %v4667_v60, %v4498_v49  ;;  %v4738_v62 = vpop.f32.mrf.mxu1 }
 0x404   :  { %v4750_v63 = vmul.f32 %v4744_v59, %v7768_v55  ;;  %v4669_v8 = vpop.f32.mrf.mxu0  ;;  %v4747_v7 = vadd.f32 %v4738_v62, %v4500_v50  ;;  %v4763_v0 = vmul.f32 %v4749_v56, %v8107_v51 }
 0x405   :  { %v4751_v16 = vmul.f32 %v4745_v61, %v7770_v58  ;;  %v4746_v17 = vadd.f32 %v4669_v8, %v4499_v54  ;;  %v4740_v18 = vpop.f32.mrf.mxu1 }
 0x406   :  { %v4755_v19 = vadd.f32 %v4750_v63, %v4749_v56  ;;  %v4764_v20 = vmul.f32 %v4750_v63, %v4744_v59  ;;  %v4748_v21 = vadd.f32 %v4740_v18, %v4501_v57  ;;  %v4753_v24 = vmul.f32 %v4747_v7, %v7779_v2 }
 0x407   :  { %v4765_v22 = vmul.f32 %v4751_v16, %v4745_v61  ;;  %v4752_v1 = vmul.f32 %v4746_v17, %v7774_v15 }
 0x408   :  { %v4769_v3 = vadd.f32 %v4764_v20, %v4763_v0  ;;  %v4756_v23 = vadd.f32 %v4755_v19, %v4751_v16  ;;  %v4754_v4 = vmul.f32 %v4748_v21, %v7784_v9  ;;  %v4767_v28 = vmul.f32 %v4753_v24, %v4747_v7 }
 0x409   :  { %v4766_v25 = vmul.f32 %v4752_v1, %v4746_v17 }
 0x40a   :  { %v4770_v26 = vadd.f32 %v4769_v3, %v4765_v22  ;;  %v4757_v27 = vadd.f32 %v4756_v23, %v4752_v1  ;;  %v4768_v5 = vmul.f32 %v4754_v4, %v4748_v21  ;;  %v4759_v11 = vsel %vm2587_vm13, %v4754_v4, 0.0 }
 0x40c   :  { %v4771_v6 = vadd.f32 %v4770_v26, %v4766_v25  ;;  %v4758_v29 = vadd.f32 %v4757_v27, %v4753_v24  ;;  %v4773_v31 = vsel %vm2587_vm13, %v4768_v5, 0.0 }
 0x40e   :  { %v4760_v12 = vadd.f32 %v4759_v11, %v4758_v29  ;;  %v4772_v30 = vadd.f32 %v4771_v6, %v4767_v28 }
 0x410   :  { %4761 = vadd.xlane.f32.xlu0 %v4760_v12  ;;  %v4774_v13 = vadd.f32 %v4773_v31, %v4772_v30 }
 0x412   :  { %4775 = vadd.xlane.f32.xlu1 %v4774_v13 }
 0x423   :  { %4805 = vperm.xlu1 %7270, %v4802_v32  }
 0x499   :  { %v4762_v33 = vpop.xlane.xlu0 %4761 }
 0x49a   :  { %v4777_v14 = vmul.f32 0.001953125, %v4762_v33 }
 0x49b   :  { %v4776_v34 = vpop.xlane.xlu1 %4775 }
 0x49c   :  { %v4778_v35 = vmul.f32 0.001953125, %v4776_v34  ;;  %v4779_v36 = vmul.f32 %v4777_v14, %v4777_v14  ;;  %v4783_v43 = vsub.f32 %v8107_v51, %v4777_v14  ;;  %v4784_v44 = vsub.f32 %v4744_v59, %v4777_v14 }
 0x49d   :  { %v4785_v45 = vsub.f32 %v4745_v61, %v4777_v14  ;;  %v4786_v46 = vsub.f32 %v4746_v17, %v4777_v14  ;;  %v4787_v47 = vsub.f32 %v4747_v7, %v4777_v14  ;;  %v4788_v48 = vsub.f32 %v4748_v21, %v4777_v14 }
 0x49e   :  { %v4780_v37 = vsub.f32 %v4778_v35, %v4779_v36 }
 0x49f   :  { %v4806_v52 = vpop.permute.xlu1 %4805 }
 0x4a0   :  { %v4781_v38 = vadd.f32 0.0001, %v4780_v37 }
 0x4a2   :  { %7271 = vrsqrt.f32 %v4781_v38 }
 0x4af   :  { %v7272_v41 = vpop.eup %7271 }
 0x4b0   :  { %v4790_v40 = vmul.f32 %v7272_v41, %v4789_v39 }
 0x4b2   :  { %4793 = vperm.xlu0 %7269, %v4790_v40  }
 0x52d   :  { %v4794_v50 = vpop.permute.xlu0 %4793 }
 0x52e   :  { %v4796_v49 = vmul.f32 %v4794_v50, %v4783_v43  ;;  %v4797_v53 = vmul.f32 %v4794_v50, %v4784_v44  ;;  %v4798_v56 = vmul.f32 %v4794_v50, %v4785_v45  ;;  %v4799_v57 = vmul.f32 %v4794_v50, %v4786_v46 }
 0x52f   :  { %v4800_v60 = vmul.f32 %v4794_v50, %v4787_v47  ;;  %v4801_v54 = vmul.f32 %v4794_v50, %v4788_v48 }
 0x530   :  { %v4809_v62 = vadd.f32 %v4806_v52, %v4797_v53  ;;  %v4808_v63 = vadd.f32 %v4806_v52, %v4796_v49  ;;  %v4811_v8 = vadd.f32 %v4806_v52, %v4799_v57  ;;  %v4810_v16 = vadd.f32 %v4806_v52, %v4798_v56 }
 0x531   :  { %v4813_v51 = vadd.f32 %v4806_v52, %v4801_v54  ;;  %v4812_v59 = vadd.f32 %v4806_v52, %v4800_v60  ;;  %v7221_v52 = vld [vmem:[%s8460_s4 + $0x50] sm:$0xff] }
 0x532   :  { %v4815_v18 = vmax.f32 %v4809_v62, 0.0  ;;  %v4814_v0 = vmax.f32 %v4808_v63, 0.0  ;;  %v4817_v17 = vmax.f32 %v4811_v8, 0.0  ;;  %v4816_v19 = vmax.f32 %v4810_v16, 0.0  ;;  %v7220_v8 = vld [vmem:[%s8460_s4 + $0x48] sm:$0xff] }
 0x533   :  { %v4819_v22 = vmax.f32 %v4813_v51, 0.0  ;;  %v4818_v1 = vmax.f32 %v4812_v59, 0.0 }
 0x534   :  { %v4821_v61 = vmul.f32 %v4815_v18, %v7768_v55  ;;  %v4820_v7 = vmul.f32 %v4814_v0, %v7765_v42  ;;  %v4823_v20 = vmul.f32 %v4817_v17, %v7774_v15  ;;  %v4822_v21 = vmul.f32 %v4816_v19, %v7770_v58 }
 0x535   :  { %v4825_v3 = vmul.f32 %v4819_v22, %v7784_v9  ;;  %v4824_v23 = vmul.f32 %v4818_v1, %v7779_v2 }
 0x536   :  { %4834 = vrot.lane.b32.xlu1 %v4821_v61, %s7285_s1  ;;  %4832 = vrot.lane.b32.xlu0 %v4820_v7, %s7285_s1  ;;  %v7228_v61 = vld [vmem:[%s8460_s4 + $0x58] sm:$0xff] }
 0x53a   :  { %4838 = vrot.lane.b32.xlu1 %v4823_v20, %s7285_s1  ;;  %4836 = vrot.lane.b32.xlu0 %v4822_v21, %s7285_s1 }
 0x53e   :  { %4842 = vrot.lane.b32.xlu1 %v4825_v3, %s7285_s1  ;;  %4840 = vrot.lane.b32.xlu0 %v4824_v23, %s7285_s1 }
 0x5a8   :  { %v4835_v24 = vpop.permute.xlu1 %4834  ;;  %v4833_v4 = vpop.permute.xlu0 %4832 }
 0x5a9   :  { %v8139_v25 = vsel %vm2529_vm11, %v4833_v4, %v4835_v24  ;;  %4855 = vst.msk [vmem:[#allocation2] sm:$0xff] %vm2541_vm10, %v4833_v4 }
 0x5ac   :  { %v4839_v26 = vpop.permute.xlu1 %4838  ;;  %v4837_v27 = vpop.permute.xlu0 %4836 }
 0x5ad   :  { %v8143_v5 = vsel %vm2529_vm11, %v4835_v24, %v4837_v27  ;;  %v8146_v6 = vsel %vm2529_vm11, %v4837_v27, %v4839_v26  ;;  %v7232_v24 = vld [vmem:[%s8460_s4 + $0x60] sm:$0xff] }
 0x5ae   :  { %4881 = vrot.lane.b32.xlu1 %v8143_v5, %s7275_s30 }
 0x5b0   :  { %v4843_v28 = vpop.permute.xlu1 %4842  ;;  %v4841_v29 = vpop.permute.xlu0 %4840  ;;  %v8150_v11 = vld [vmem:[#allocation2] sm:$0xff] }
 0x5b1   :  { %v8153_v12 = vsel %vm2529_vm11, %v4839_v26, %v4841_v29  ;;  %v4848_v30 = vsel %vm2529_vm11, %v4841_v29, %v4843_v28  ;;  %4877 = vrot.lane.b32.xlu0 %v8150_v11, %s7275_s30  ;;  %v7236_v28 = vld [vmem:[%s8460_s4 + $0x68] sm:$0xff] }
 0x5b2   :  { %4860 = vst.msk [vmem:[#allocation2 + $0x28] sm:$0xff] %vm2547_vm12, %v4848_v30  ;;  %4883 = vrot.lane.b32.xlu1 %v8146_v6, %s7275_s30 }
 0x5b5   :  { %5334 = vrot.lane.b32.xlu0 %v8150_v11, %s7277_s26 }
 0x5b9   :  { %5581 = vrot.lane.b32.xlu0 %v8150_v11, %s7278_s0  ;;  %v8165_v31 = vld [vmem:[#allocation2 + $0x28] sm:$0xff] }
 0x5ba   :  { %4887 = vrot.lane.b32.xlu1 %v8165_v31, %s7275_s30 }
 0x5bd   :  { %5828 = vrot.lane.b32.xlu0 %v8150_v11, %s7279_s27 }
 0x5be   :  { %5338 = vrot.lane.b32.xlu1 %v8143_v5, %s7277_s26 }
 0x5c1   :  { %6075 = vrot.lane.b32.xlu0 %v8150_v11, %s7280_s28 }
 0x5c2   :  { %5340 = vrot.lane.b32.xlu1 %v8146_v6, %s7277_s26 }
 0x5c5   :  { %6322 = vrot.lane.b32.xlu0 %v8150_v11, %s7281_s29 }
 0x5c6   :  { %5344 = vrot.lane.b32.xlu1 %v8165_v31, %s7277_s26 }
 0x5c9   :  { %6569 = vrot.lane.b32.xlu0 %v8150_v11, %s7282_s12 }
 0x5ca   :  { %5585 = vrot.lane.b32.xlu1 %v8143_v5, %s7278_s0 }
 0x5cd   :  { %6816 = vrot.lane.b32.xlu0 %v8150_v11, %s7283_s15 }
 0x5ce   :  { %5589 = vrot.lane.b32.xlu1 %v8153_v12, %s7278_s0 }
 0x5d1   :  { %4879 = vrot.lane.b32.xlu0 %v8139_v25, %s7275_s30 }
 0x5d2   :  { %5830 = vrot.lane.b32.xlu1 %v8139_v25, %s7279_s27 }
 0x5d5   :  { %4885 = vrot.lane.b32.xlu0 %v8153_v12, %s7275_s30 }
 0x5d6   :  { %5591 = vrot.lane.b32.xlu1 %v8165_v31, %s7278_s0 }
 0x5d9   :  { %5336 = vrot.lane.b32.xlu0 %v8139_v25, %s7277_s26 }
 0x5da   :  { %5834 = vrot.lane.b32.xlu1 %v8146_v6, %s7279_s27 }
 0x5dd   :  { %5342 = vrot.lane.b32.xlu0 %v8153_v12, %s7277_s26 }
 0x5de   :  { %5838 = vrot.lane.b32.xlu1 %v8165_v31, %s7279_s27 }
 0x5e1   :  { %5583 = vrot.lane.b32.xlu0 %v8139_v25, %s7278_s0 }
 0x5e2   :  { %6079 = vrot.lane.b32.xlu1 %v8143_v5, %s7280_s28 }
 0x5e5   :  { %5587 = vrot.lane.b32.xlu0 %v8146_v6, %s7278_s0 }
 0x5e6   :  { %6083 = vrot.lane.b32.xlu1 %v8153_v12, %s7280_s28 }
 0x5e9   :  { %5832 = vrot.lane.b32.xlu0 %v8143_v5, %s7279_s27 }
 0x5ea   :  { %6324 = vrot.lane.b32.xlu1 %v8139_v25, %s7281_s29 }
 0x5ed   :  { %5836 = vrot.lane.b32.xlu0 %v8153_v12, %s7279_s27 }
 0x5ee   :  { %6085 = vrot.lane.b32.xlu1 %v8165_v31, %s7280_s28 }
 0x5f1   :  { %6077 = vrot.lane.b32.xlu0 %v8139_v25, %s7280_s28 }
 0x5f2   :  { %6328 = vrot.lane.b32.xlu1 %v8146_v6, %s7281_s29 }
 0x5f5   :  { %6081 = vrot.lane.b32.xlu0 %v8146_v6, %s7280_s28 }
 0x5f6   :  { %6332 = vrot.lane.b32.xlu1 %v8165_v31, %s7281_s29 }
 0x5f9   :  { %6326 = vrot.lane.b32.xlu0 %v8143_v5, %s7281_s29 }
 0x5fa   :  { %6573 = vrot.lane.b32.xlu1 %v8143_v5, %s7282_s12 }
 0x5fd   :  { %6330 = vrot.lane.b32.xlu0 %v8153_v12, %s7281_s29 }
 0x5fe   :  { %6577 = vrot.lane.b32.xlu1 %v8153_v12, %s7282_s12 }
 0x601   :  { %6571 = vrot.lane.b32.xlu0 %v8139_v25, %s7282_s12 }
 0x602   :  { %6818 = vrot.lane.b32.xlu1 %v8139_v25, %s7283_s15 }
 0x605   :  { %6575 = vrot.lane.b32.xlu0 %v8146_v6, %s7282_s12 }
 0x606   :  { %6579 = vrot.lane.b32.xlu1 %v8165_v31, %s7282_s12 }
 0x609   :  { %6820 = vrot.lane.b32.xlu0 %v8143_v5, %s7283_s15 }
 0x60a   :  { %6822 = vrot.lane.b32.xlu1 %v8146_v6, %s7283_s15 }
 0x60d   :  { %6824 = vrot.lane.b32.xlu0 %v8153_v12, %s7283_s15 }
 0x60e   :  { %6826 = vrot.lane.b32.xlu1 %v8165_v31, %s7283_s15 }
 0x620   :  { %v4882_v13 = vpop.permute.xlu1 %4881 }
 0x623   :  { %v4878_v32 = vpop.permute.xlu0 %4877 }
 0x624   :  { %v4884_v14 = vpop.permute.xlu1 %4883 }
 0x625   :  { %v4891_v54 = vsel %vm103_vm1, %v4882_v13, %v4884_v14 }
 0x627   :  { %v5335_v33 = vpop.permute.xlu0 %5334 }
 0x62b   :  { %v8253_v34 = vpop.permute.xlu0 %5581 }
 0x62c   :  { %v4888_v35 = vpop.permute.xlu1 %4887 }
 0x62f   :  { %v8255_v36 = vpop.permute.xlu0 %5828 }
 0x630   :  { %v5339_v37 = vpop.permute.xlu1 %5338 }
 0x633   :  { %v8257_v38 = vpop.permute.xlu0 %6075 }
 0x634   :  { %v5341_v39 = vpop.permute.xlu1 %5340 }
 0x635   :  { %v5348_v7 = vsel %vm585_vm3, %v5339_v37, %v5341_v39 }
 0x637   :  { %v8259_v41 = vpop.permute.xlu0 %6322 }
 0x638   :  { %v5345_v40 = vpop.permute.xlu1 %5344 }
 0x63b   :  { %v8261_v43 = vpop.permute.xlu0 %6569 }
 0x63c   :  { %v8263_v44 = vpop.permute.xlu1 %5585 }
 0x63f   :  { %v8265_v45 = vpop.permute.xlu0 %6816 }
 0x640   :  { %v8267_v46 = vpop.permute.xlu1 %5589 }
 0x643   :  { %v4880_v47 = vpop.permute.xlu0 %4879 }
 0x644   :  { %v4889_v48 = vsel %vm103_vm1, %v4878_v32, %v4880_v47  ;;  %v4890_v50 = vsel %vm103_vm1, %v4880_v47, %v4882_v13  ;;  %v8274_v49 = vpop.permute.xlu1 %5830 }
 0x645   :  { %4933 = vmatprep.subr.mxu0 %v4890_v50 }
 0x646   :  { %4934 = vmatpush1.msra.mxu0 %v4889_v48 }
 0x647   :  { %7222 = vmatmul.mubr.msk.f32.vlgmr.msra.gmra.mxu0 %vm2587_vm13, %v7221_v52  ;;  %5075 = vmatprep.subr.mxu0 %v4888_v35  ;;  %v4886_v53 = vpop.permute.xlu0 %4885 }
 0x648   :  { %v4893_v56 = vsel %vm103_vm1, %v4886_v53, %v4888_v35  ;;  %v4892_v57 = vsel %vm103_vm1, %v4884_v14, %v4886_v53  ;;  %5109 = vmatprep.mubr.f32.mxu0 %v7276_v10  ;;  %v5592_v60 = vpop.permute.xlu1 %5591  ;;  %v7240_v14 = vld [vmem:[%s8460_s4 + $0x70] sm:$0xff] }
 0x649   :  { %5004 = vmatprep.subr.mxu1 %v4892_v57  ;;  %5076 = vmatpush1.msra.mxu0 %v4893_v56 }
 0x64a   :  { %5005 = vmatpush1.msra.mxu1 %v4891_v54  ;;  %5220 = vmatprep.subr.mxu0 %v8146_v6  ;;  %v5840_v6 = vsel %vm1127_vm5, %v8255_v36, %v8274_v49  ;;  %v7248_v54 = vld [vmem:[%s8460_s4 + $0x80] sm:$0xff] }
 0x64b   :  { %7223 = vmatmul.mubr.msk.f32.vlgmr.msra.gmra.mxu1 %vm2587_vm13, %v7221_v52  ;;  %7224 = vmatmul.mubr.msk.f32.vlgmr.msra.gmra.mxu0 %vm2587_vm13, %v7221_v52  ;;  %v5337_v62 = vpop.permute.xlu0 %5336 }
 0x64c   :  { %5149 = vmatprep.subr.mxu1 %v8139_v25  ;;  %5221 = vmatpush1.msra.mxu0 %v8143_v5  ;;  %v5347_v63 = vsel %vm585_vm3, %v5337_v62, %v5339_v37  ;;  %v8290_v16 = vpop.permute.xlu1 %5834  ;;  %v5346_v0 = vsel %vm585_vm3, %v5335_v33, %v5337_v62  ;;  %v5597_v25 = vsel %vm856_vm4, %v8267_v46, %v5592_v60 }
 0x64d   :  { %5150 = vmatpush1.msra.mxu1 %v8150_v11  ;;  %5390 = vmatprep.subr.mxu0 %v5347_v63 }
 0x64e   :  { %5291 = vmatprep.subr.mxu1 %v8165_v31  ;;  %5183 = vmatprep.mubr.f32.mxu1 %v7276_v10 }
 0x64f   :  { %5254 = vmatprep.mubr.f32.mxu0 %v7276_v10  ;;  %7225 = vmatmul.mubr.msk.f32.vlgmr.msra.gmra.mxu1 %vm2587_vm13, %v7220_v8  ;;  %v5343_v18 = vpop.permute.xlu0 %5342 }
 0x650   :  { %7226 = vmatmul.mubr.msk.f32.vlgmr.msra.gmra.mxu0 %vm2587_vm13, %v7220_v8  ;;  %5292 = vmatpush1.msra.mxu1 %v8153_v12  ;;  %v5349_v51 = vsel %vm585_vm3, %v5341_v39, %v5343_v18  ;;  %v5839_v59 = vpop.permute.xlu1 %5838  ;;  %v5350_v19 = vsel %vm585_vm3, %v5343_v18, %v5345_v40 }
 0x651   :  { %5391 = vmatpush1.msra.mxu0 %v5346_v0  ;;  %5461 = vmatprep.subr.mxu1 %v5349_v51 }
 0x652   :  { %5532 = vmatprep.subr.mxu0 %v5345_v40  ;;  %5325 = vmatprep.mubr.f32.mxu1 %v7276_v10 }
 0x653   :  { %5424 = vmatprep.mubr.f32.mxu0 %v7276_v10  ;;  %7227 = vmatmul.mubr.msk.f32.vlgmr.msra.gmra.mxu1 %vm2587_vm13, %v7220_v8  ;;  %v5584_v17 = vpop.permute.xlu0 %5583 }
 0x654   :  { %7229 = vmatmul.mubr.msk.f32.vlgmr.msra.gmra.mxu0 %vm2587_vm13, %v7228_v61  ;;  %5462 = vmatpush1.msra.mxu1 %v5348_v7  ;;  %v5594_v20 = vsel %vm856_vm4, %v5584_v17, %v8263_v44  ;;  %v6080_v21 = vpop.permute.xlu1 %6079  ;;  %v5593_v22 = vsel %vm856_vm4, %v8253_v34, %v5584_v17 }
 0x655   :  { %5533 = vmatpush1.msra.mxu0 %v5350_v19  ;;  %5637 = vmatprep.subr.mxu1 %v5594_v20 }
 0x656   :  { %5495 = vmatprep.mubr.f32.mxu1 %v7276_v10  ;;  %5566 = vmatprep.mubr.f32.mxu0 %v7276_v10 }
 0x657   :  { %7230 = vmatmul.mubr.msk.f32.vlgmr.msra.gmra.mxu1 %vm2587_vm13, %v7228_v61  ;;  %v5588_v1 = vpop.permute.xlu0 %5587 }
 0x658   :  { %7231 = vmatmul.mubr.msk.f32.vlgmr.msra.gmra.mxu0 %vm2587_vm13, %v7228_v61  ;;  %5638 = vmatpush1.msra.mxu1 %v5593_v22  ;;  %v5595_v3 = vsel %vm856_vm4, %v8263_v44, %v5588_v1  ;;  %v5596_v23 = vsel %vm856_vm4, %v5588_v1, %v8267_v46  ;;  %v6084_v4 = vpop.permute.xlu1 %6083  ;;  %v7244_v46 = vld [vmem:[%s8460_s4 + $0x78] sm:$0xff] }
 0x659   :  { %5779 = vmatprep.subr.mxu1 %v5592_v60  ;;  %5708 = vmatprep.subr.mxu0 %v5596_v23 }
 0x65a   :  { %5671 = vmatprep.mubr.f32.mxu1 %v7276_v10  ;;  %5709 = vmatpush1.msra.mxu0 %v5595_v3 }
 0x65b   :  { %5742 = vmatprep.mubr.f32.mxu0 %v7276_v10  ;;  %7233 = vmatmul.mubr.msk.f32.vlgmr.msra.gmra.mxu1 %vm2587_vm13, %v7232_v24  ;;  %v5833_v26 = vpop.permute.xlu0 %5832 }
 0x65c   :  { %7234 = vmatmul.mubr.msk.f32.vlgmr.msra.gmra.mxu0 %vm2587_vm13, %v7232_v24  ;;  %5780 = vmatpush1.msra.mxu1 %v5597_v25  ;;  %v5841_v27 = vsel %vm1127_vm5, %v8274_v49, %v5833_v26  ;;  %v6325_v5 = vpop.permute.xlu1 %6324  ;;  %v5842_v31 = vsel %vm1127_vm5, %v5833_v26, %v8290_v16 }
 0x65d   :  { %5884 = vmatprep.subr.mxu0 %v5841_v27  ;;  %5813 = vmatprep.mubr.f32.mxu1 %v7276_v10  ;;  %v6334_v48 = vsel %vm1669_vm7, %v8259_v41, %v6325_v5 }
 0x65e   :  { %5885 = vmatpush1.msra.mxu0 %v5840_v6  ;;  %5918 = vmatprep.mubr.f32.mxu0 %v7276_v10 }
 0x65f   :  { %7235 = vmatmul.mubr.msk.f32.vlgmr.msra.gmra.mxu1 %vm2587_vm13, %v7232_v24  ;;  %6026 = vmatprep.subr.mxu0 %v5839_v59  ;;  %v5837_v29 = vpop.permute.xlu0 %5836 }
 0x660   :  { %7237 = vmatmul.mubr.msk.f32.vlgmr.msra.gmra.mxu0 %vm2587_vm13, %v7236_v28  ;;  %v5844_v11 = vsel %vm1127_vm5, %v5837_v29, %v5839_v59  ;;  %v5843_v12 = vsel %vm1127_vm5, %v8290_v16, %v5837_v29  ;;  %5989 = vmatprep.mubr.f32.mxu1 %v7276_v10  ;;  %v6086_v30 = vpop.permute.xlu1 %6085  ;;  %v7252_v59 = vld [vmem:[%s8460_s4 + $0x88] sm:$0xff] }
 0x661   :  { %5955 = vmatprep.subr.mxu1 %v5843_v12  ;;  %6027 = vmatpush1.msra.mxu0 %v5844_v11  ;;  %v6091_v35 = vsel %vm1398_vm6, %v6084_v4, %v6086_v30 }
 0x662   :  { %5956 = vmatpush1.msra.mxu1 %v5842_v31  ;;  %6060 = vmatprep.mubr.f32.mxu0 %v7276_v10 }
 0x663   :  { %7238 = vmatmul.mubr.msk.f32.vlgmr.msra.gmra.mxu1 %vm2587_vm13, %v7236_v28  ;;  %v6078_v13 = vpop.permute.xlu0 %6077 }
 0x664   :  { %7239 = vmatmul.mubr.msk.f32.vlgmr.msra.gmra.mxu0 %vm2587_vm13, %v7236_v28  ;;  %v6087_v32 = vsel %vm1398_vm6, %v8257_v38, %v6078_v13  ;;  %v6088_v33 = vsel %vm1398_vm6, %v6078_v13, %v6080_v21  ;;  %6165 = vmatprep.mubr.f32.mxu1 %v7276_v10  ;;  %v6329_v34 = vpop.permute.xlu1 %6328 }
 0x665   :  { %6131 = vmatprep.subr.mxu1 %v6088_v33  ;;  %6236 = vmatprep.mubr.f32.mxu0 %v7276_v10 }
 0x666   :  { %6132 = vmatpush1.msra.mxu1 %v6087_v32 }
 0x667   :  { %7241 = vmatmul.mubr.msk.f32.vlgmr.msra.gmra.mxu1 %vm2587_vm13, %v7240_v14  ;;  %6273 = vmatprep.subr.mxu1 %v6086_v30  ;;  %v6082_v36 = vpop.permute.xlu0 %6081 }
 0x668   :  { %v6089_v37 = vsel %vm1398_vm6, %v6080_v21, %v6082_v36  ;;  %6274 = vmatpush1.msra.mxu1 %v6091_v35  ;;  %v6090_v38 = vsel %vm1398_vm6, %v6082_v36, %v6084_v4  ;;  %6307 = vmatprep.mubr.f32.mxu1 %v7276_v10  ;;  %v6333_v39 = vpop.permute.xlu1 %6332 }
 0x669   :  { %6202 = vmatprep.subr.mxu0 %v6090_v38 }
 0x66a   :  { %6203 = vmatpush1.msra.mxu0 %v6089_v37 }
 0x66b   :  { %7242 = vmatmul.mubr.msk.f32.vlgmr.msra.gmra.mxu0 %vm2587_vm13, %v7240_v14  ;;  %7243 = vmatmul.mubr.msk.f32.vlgmr.msra.gmra.mxu1 %vm2587_vm13, %v7240_v14  ;;  %v6327_v40 = vpop.permute.xlu0 %6326 }
 0x66c   :  { %v6335_v44 = vsel %vm1669_vm7, %v6325_v5, %v6327_v40  ;;  %6412 = vmatprep.mubr.f32.mxu0 %v7276_v10  ;;  %v6574_v47 = vpop.permute.xlu1 %6573  ;;  %6483 = vmatprep.mubr.f32.mxu1 %v7276_v10  ;;  %v6336_v56 = vsel %vm1669_vm7, %v6327_v40, %v6329_v34 }
 0x66d   :  { %6378 = vmatprep.subr.mxu0 %v6335_v44 }
 0x66e   :  { %6379 = vmatpush1.msra.mxu0 %v6334_v48 }
 0x66f   :  { %7245 = vmatmul.mubr.msk.f32.vlgmr.msra.gmra.mxu0 %vm2587_vm13, %v7244_v46  ;;  %6520 = vmatprep.subr.mxu0 %v6333_v39  ;;  %v6331_v50 = vpop.permute.xlu0 %6330 }
 0x670   :  { %v6338_v52 = vsel %vm1669_vm7, %v6331_v50, %v6333_v39  ;;  %v6337_v49 = vsel %vm1669_vm7, %v6329_v34, %v6331_v50  ;;  %6554 = vmatprep.mubr.f32.mxu0 %v7276_v10  ;;  %v6578_v53 = vpop.permute.xlu1 %6577 }
 0x671   :  { %6449 = vmatprep.subr.mxu1 %v6337_v49  ;;  %6521 = vmatpush1.msra.mxu0 %v6338_v52 }
 0x672   :  { %6450 = vmatpush1.msra.mxu1 %v6336_v56 }
 0x673   :  { %7246 = vmatmul.mubr.msk.f32.vlgmr.msra.gmra.mxu1 %vm2587_vm13, %v7244_v46  ;;  %7247 = vmatmul.mubr.msk.f32.vlgmr.msra.gmra.mxu0 %vm2587_vm13, %v7244_v46  ;;  %v6572_v41 = vpop.permute.xlu0 %6571 }
 0x674   :  { %v6581_v57 = vsel %vm1940_vm8, %v8261_v43, %v6572_v41  ;;  %v6582_v60 = vsel %vm1940_vm8, %v6572_v41, %v6574_v47  ;;  %6659 = vmatprep.mubr.f32.mxu1 %v7276_v10  ;;  %v6819_v62 = vpop.permute.xlu1 %6818  ;;  %6730 = vmatprep.mubr.f32.mxu0 %v7276_v10 }
 0x675   :  { %6625 = vmatprep.subr.mxu1 %v6582_v60  ;;  %v6828_v7 = vsel %vm2211_vm9, %v8265_v45, %v6819_v62 }
 0x676   :  { %6626 = vmatpush1.msra.mxu1 %v6581_v57 }
 0x677   :  { %7249 = vmatmul.mubr.msk.f32.vlgmr.msra.gmra.mxu1 %vm2587_vm13, %v7248_v54  ;;  %v6576_v63 = vpop.permute.xlu0 %6575 }
 0x678   :  { %v6583_v8 = vsel %vm1940_vm8, %v6574_v47, %v6576_v63  ;;  %v6584_v43 = vsel %vm1940_vm8, %v6576_v63, %v6578_v53  ;;  %v6580_v16 = vpop.permute.xlu1 %6579  ;;  %6801 = vmatprep.mubr.f32.mxu1 %v7276_v10 }
 0x679   :  { %6696 = vmatprep.subr.mxu0 %v6584_v43  ;;  %v6585_v18 = vsel %vm1940_vm8, %v6578_v53, %v6580_v16  ;;  %6767 = vmatprep.subr.mxu1 %v6580_v16 }
 0x67a   :  { %6697 = vmatpush1.msra.mxu0 %v6583_v8  ;;  %6768 = vmatpush1.msra.mxu1 %v6585_v18 }
 0x67b   :  { %7250 = vmatmul.mubr.msk.f32.vlgmr.msra.gmra.mxu0 %vm2587_vm13, %v7248_v54  ;;  %v6821_v0 = vpop.permute.xlu0 %6820  ;;  %7251 = vmatmul.mubr.msk.f32.vlgmr.msra.gmra.mxu1 %vm2587_vm13, %v7248_v54 }
 0x67c   :  { %v6829_v51 = vsel %vm2211_vm9, %v6819_v62, %v6821_v0  ;;  %6906 = vmatprep.mubr.f32.mxu0 %v7276_v10  ;;  %v6823_v61 = vpop.permute.xlu1 %6822  ;;  %6977 = vmatprep.mubr.f32.mxu1 %v7276_v10 }
 0x67d   :  { %6872 = vmatprep.subr.mxu0 %v6829_v51  ;;  %v6830_v21 = vsel %vm2211_vm9, %v6821_v0, %v6823_v61 }
 0x67e   :  { %6873 = vmatpush1.msra.mxu0 %v6828_v7 }
 0x67f   :  { %7253 = vmatmul.mubr.msk.f32.vlgmr.msra.gmra.mxu0 %vm2587_vm13, %v7252_v59  ;;  %v6825_v17 = vpop.permute.xlu0 %6824 }
 0x680   :  { %v6831_v19 = vsel %vm2211_vm9, %v6823_v61, %v6825_v17  ;;  %v6827_v20 = vpop.permute.xlu1 %6826  ;;  %7048 = vmatprep.mubr.f32.mxu0 %v7276_v10 }
 0x681   :  { %6943 = vmatprep.subr.mxu1 %v6831_v19  ;;  %v6832_v22 = vsel %vm2211_vm9, %v6825_v17, %v6827_v20  ;;  %7014 = vmatprep.subr.mxu0 %v6827_v20 }
 0x682   :  { %6944 = vmatpush1.msra.mxu1 %v6830_v21  ;;  %7015 = vmatpush1.msra.mxu0 %v6832_v22 }
 0x683   :  { %7254 = vmatmul.mubr.msk.f32.vlgmr.msra.gmra.mxu1 %vm2587_vm13, %v7252_v59  ;;  %7255 = vmatmul.mubr.msk.f32.vlgmr.msra.gmra.mxu0 %vm2587_vm13, %v7252_v59 }
 0x707   :  { %v4969_v45 = vpop.f32.mrf.mxu0 }
 0x709   :  { %v4971_v1 = vpop.f32.mrf.mxu0 }
 0x70b   :  { %v5040_v3 = vpop.f32.mrf.mxu1  ;;  %v5111_v23 = vpop.f32.mrf.mxu0 }
 0x70d   :  { %v5042_v24 = vpop.f32.mrf.mxu1  ;;  %v5113_v4 = vpop.f32.mrf.mxu0 }
 0x70f   :  { %v5185_v25 = vpop.f32.mrf.mxu1 }
 0x710   :  { %v5256_v10 = vpop.f32.mrf.mxu0  ;;  %v5186_v41 = vadd.f32 %v5185_v25, %v4969_v45 }
 0x711   :  { %v5187_v26 = vpop.f32.mrf.mxu1  ;;  %v5257_v8 = vadd.f32 %v5256_v10, %v5040_v3 }
 0x712   :  { %v5258_v27 = vpop.f32.mrf.mxu0  ;;  %v5188_v60 = vadd.f32 %v5187_v26, %v4971_v1 }
 0x713   :  { %v5327_v5 = vpop.f32.mrf.mxu1  ;;  %v5259_v0 = vadd.f32 %v5258_v27, %v5042_v24 }
 0x714   :  { %v5426_v6 = vpop.f32.mrf.mxu0  ;;  %v5328_v43 = vadd.f32 %v5327_v5, %v5111_v23 }
 0x715   :  { %v5329_v28 = vpop.f32.mrf.mxu1  ;;  %v5573_v54 = vadd.f32 %v5426_v6, %v5186_v41 }
 0x716   :  { %v5428_v29 = vpop.f32.mrf.mxu0  ;;  %v5330_v19 = vadd.f32 %v5329_v28, %v5113_v4 }
 0x717   :  { %v5497_v11 = vpop.f32.mrf.mxu1  ;;  %v5574_v16 = vadd.f32 %v5428_v29, %v5188_v60 }
 0x718   :  { %v5568_v12 = vpop.f32.mrf.mxu0  ;;  %v5575_v59 = vadd.f32 %v5497_v11, %v5257_v8 }
 0x719   :  { %v5499_v30 = vpop.f32.mrf.mxu1  ;;  %v5577_v61 = vadd.f32 %v5568_v12, %v5328_v43 }
 0x71a   :  { %v5570_v31 = vpop.f32.mrf.mxu0  ;;  %v5576_v20 = vadd.f32 %v5499_v30, %v5259_v0 }
 0x71b   :  { %v5673_v13 = vpop.f32.mrf.mxu1  ;;  %v5578_v6 = vadd.f32 %v5570_v31, %v5330_v19 }
 0x71c   :  { %v5744_v32 = vpop.f32.mrf.mxu0  ;;  %v5820_v18 = vadd.f32 %v5673_v13, %v5573_v54 }
 0x71d   :  { %v5675_v33 = vpop.f32.mrf.mxu1  ;;  %v5822_v45 = vadd.f32 %v5744_v32, %v5575_v59 }
 0x71e   :  { %v5746_v14 = vpop.f32.mrf.mxu0  ;;  %v5821_v7 = vadd.f32 %v5675_v33, %v5574_v16 }
 0x71f   :  { %v5815_v34 = vpop.f32.mrf.mxu1  ;;  %v5823_v41 = vadd.f32 %v5746_v14, %v5576_v20 }
 0x720   :  { %v5920_v35 = vpop.f32.mrf.mxu0  ;;  %v5824_v25 = vadd.f32 %v5815_v34, %v5577_v61 }
 0x721   :  { %v5817_v36 = vpop.f32.mrf.mxu1  ;;  %v6067_v17 = vadd.f32 %v5920_v35, %v5820_v18 }
 0x722   :  { %v5922_v37 = vpop.f32.mrf.mxu0  ;;  %v5825_v27 = vadd.f32 %v5817_v36, %v5578_v6 }
 0x723   :  { %v5991_v38 = vpop.f32.mrf.mxu1  ;;  %v6068_v1 = vadd.f32 %v5922_v37, %v5821_v7 }
 0x724   :  { %v6062_v39 = vpop.f32.mrf.mxu0  ;;  %v6069_v23 = vadd.f32 %v5991_v38, %v5822_v45 }
 0x725   :  { %v5993_v40 = vpop.f32.mrf.mxu1  ;;  %v6071_v10 = vadd.f32 %v6062_v39, %v5824_v25 }
 0x726   :  { %v6064_v46 = vpop.f32.mrf.mxu0  ;;  %v6070_v29 = vadd.f32 %v5993_v40, %v5823_v41 }
 0x727   :  { %v6167_v44 = vpop.f32.mrf.mxu1  ;;  %v6072_v33 = vadd.f32 %v6064_v46, %v5825_v27 }
 0x728   :  { %v6314_v26 = vadd.f32 %v6167_v44, %v6067_v17 }
 0x729   :  { %v6169_v47 = vpop.f32.mrf.mxu1 }
 0x72a   :  { %v6315_v5 = vadd.f32 %v6169_v47, %v6068_v1 }
 0x72b   :  { %v6238_v48 = vpop.f32.mrf.mxu0  ;;  %v6309_v50 = vpop.f32.mrf.mxu1 }
 0x72c   :  { %v6316_v13 = vadd.f32 %v6238_v48, %v6069_v23  ;;  %v6318_v4 = vadd.f32 %v6309_v50, %v6071_v10 }
 0x72d   :  { %v6240_v52 = vpop.f32.mrf.mxu0  ;;  %v6311_v53 = vpop.f32.mrf.mxu1 }
 0x72e   :  { %v6317_v32 = vadd.f32 %v6240_v52, %v6070_v29  ;;  %v6319_v38 = vadd.f32 %v6311_v53, %v6072_v33 }
 0x72f   :  { %v6414_v49 = vpop.f32.mrf.mxu0 }
 0x730   :  { %v6561_v24 = vadd.f32 %v6414_v49, %v6314_v26 }
 0x731   :  { %v6416_v56 = vpop.f32.mrf.mxu0 }
 0x732   :  { %v6562_v28 = vadd.f32 %v6416_v56, %v6315_v5 }
 0x733   :  { %v6485_v57 = vpop.f32.mrf.mxu1  ;;  %v6556_v62 = vpop.f32.mrf.mxu0 }
 0x734   :  { %v6563_v35 = vadd.f32 %v6485_v57, %v6316_v13  ;;  %v6565_v37 = vadd.f32 %v6556_v62, %v6318_v4 }
 0x735   :  { %v6487_v63 = vpop.f32.mrf.mxu1  ;;  %v6558_v21 = vpop.f32.mrf.mxu0 }
 0x736   :  { %v6564_v39 = vadd.f32 %v6487_v63, %v6317_v32  ;;  %v6566_v49 = vadd.f32 %v6558_v21, %v6319_v38 }
 0x737   :  { %v6661_v51 = vpop.f32.mrf.mxu1 }
 0x738   :  { %v6808_v30 = vadd.f32 %v6661_v51, %v6561_v24  ;;  %v7257_v24 = vld [vmem:[%s8461_s6 + $0x8] sm:$0xff] }
 0x739   :  { %v6663_v22 = vpop.f32.mrf.mxu1 }
 0x73a   :  { %v6809_v31 = vadd.f32 %v6663_v22, %v6562_v28 }
 0x73b   :  { %v6732_v3 = vpop.f32.mrf.mxu0  ;;  %v6803_v12 = vpop.f32.mrf.mxu1 }
 0x73c   :  { %v6810_v36 = vadd.f32 %v6732_v3, %v6563_v35  ;;  %v6812_v40 = vadd.f32 %v6803_v12, %v6565_v37 }
 0x73d   :  { %v6734_v11 = vpop.f32.mrf.mxu0  ;;  %v6805_v44 = vpop.f32.mrf.mxu1 }
 0x73e   :  { %v6811_v52 = vadd.f32 %v6734_v11, %v6564_v39  ;;  %v6813_v53 = vadd.f32 %v6805_v44, %v6566_v49 }
 0x73f   :  { %v6908_v34 = vpop.f32.mrf.mxu0 }
 0x740   :  { %v8412_v14 = vadd.f32 %v6908_v34, %v6808_v30  ;;  %v7256_v30 = vld [vmem:[%s8462_s5 + $0x8] sm:$0xff] }
 0x741   :  { %v6910_v47 = vpop.f32.mrf.mxu0 }
 0x742   :  { %v7061_v48 = vmul.f32 %v8412_v14, %v7765_v42  ;;  %v7056_v50 = vadd.f32 %v6910_v47, %v6809_v31 }
 0x743   :  { %v6979_v56 = vpop.f32.mrf.mxu1  ;;  %v7050_v46 = vpop.f32.mrf.mxu0 }
 0x744   :  { %v7062_v57 = vmul.f32 %v7056_v50, %v7768_v55  ;;  %v7057_v60 = vadd.f32 %v6979_v56, %v6810_v36  ;;  %v7059_v54 = vadd.f32 %v7050_v46, %v6812_v40  ;;  %v7075_v62 = vmul.f32 %v7061_v48, %v8412_v14 }
 0x745   :  { %v6981_v63 = vpop.f32.mrf.mxu1  ;;  %v7052_v8 = vpop.f32.mrf.mxu0 }
 0x746   :  { %v7067_v43 = vadd.f32 %v7062_v57, %v7061_v48  ;;  %v7076_v16 = vmul.f32 %v7062_v57, %v7056_v50  ;;  %v7063_v18 = vmul.f32 %v7057_v60, %v7770_v58  ;;  %v7058_v0 = vadd.f32 %v6981_v63, %v6811_v52 }
 0x747   :  { %v7065_v51 = vmul.f32 %v7059_v54, %v7779_v2  ;;  %v7060_v59 = vadd.f32 %v7052_v8, %v6813_v53 }
 0x748   :  { %v7081_v61 = vadd.f32 %v7076_v16, %v7075_v62  ;;  %v7068_v7 = vadd.f32 %v7067_v43, %v7063_v18  ;;  %v7077_v17 = vmul.f32 %v7063_v18, %v7057_v60  ;;  %v7064_v19 = vmul.f32 %v7058_v0, %v7774_v15 }
 0x749   :  { %v7066_v20 = vmul.f32 %v7060_v59, %v7784_v9  ;;  %v7079_v26 = vmul.f32 %v7065_v51, %v7059_v54 }
 0x74a   :  { %v7082_v21 = vadd.f32 %v7081_v61, %v7077_v17  ;;  %v7069_v22 = vadd.f32 %v7068_v7, %v7064_v19  ;;  %v7078_v45 = vmul.f32 %v7064_v19, %v7058_v0 }
 0x74b   :  { %v7080_v25 = vmul.f32 %v7066_v20, %v7060_v59  ;;  %v7071_v41 = vsel %vm2587_vm13, %v7066_v20, 0.0 }
 0x74c   :  { %v7083_v1 = vadd.f32 %v7082_v21, %v7078_v45  ;;  %v7070_v6 = vadd.f32 %v7069_v22, %v7065_v51 }
 0x74d   :  { %v7085_v10 = vsel %vm2587_vm13, %v7080_v25, 0.0 }
 0x74e   :  { %v7072_v3 = vadd.f32 %v7071_v41, %v7070_v6  ;;  %v7084_v23 = vadd.f32 %v7083_v1, %v7079_v26 }
 0x750   :  { %7073 = vadd.xlane.f32.xlu0 %v7072_v3  ;;  %v7086_v5 = vadd.f32 %v7085_v10, %v7084_v23 }
 0x752   :  { %7087 = vadd.xlane.f32.xlu1 %v7086_v5 }
 0x763   :  { %7119 = vperm.xlu1 %7270, %v7257_v24  }
 0x7d9   :  { %v7074_v27 = vpop.xlane.xlu0 %7073 }
 0x7da   :  { %v7089_v29 = vmul.f32 0.001953125, %v7074_v27 }
 0x7db   :  { %v7088_v11 = vpop.xlane.xlu1 %7087 }
 0x7dc   :  { %v7090_v12 = vmul.f32 0.001953125, %v7088_v11  ;;  %v7091_v13 = vmul.f32 %v7089_v29, %v7089_v29  ;;  %v7095_v34 = vsub.f32 %v8412_v14, %v7089_v29  ;;  %v7096_v35 = vsub.f32 %v7056_v50, %v7089_v29 }
 0x7dd   :  { %v7097_v37 = vsub.f32 %v7057_v60, %v7089_v29  ;;  %v7098_v31 = vsub.f32 %v7058_v0, %v7089_v29  ;;  %v7099_v38 = vsub.f32 %v7059_v54, %v7089_v29  ;;  %v7100_v39 = vsub.f32 %v7060_v59, %v7089_v29 }
 0x7de   :  { %v7092_v4 = vsub.f32 %v7090_v12, %v7091_v13 }
 0x7df   :  { %v7120_v49 = vpop.permute.xlu1 %7119 }
 0x7e0   :  { %v7093_v28 = vadd.f32 0.0001, %v7092_v4 }
 0x7e2   :  { %7273 = vrsqrt.f32 %v7093_v28 }
 0x7ef   :  { %v7274_v33 = vpop.eup %7273 }
 0x7f0   :  { %v7103_v32 = vmul.f32 %v7274_v33, %v7256_v30 }
 0x7f2   :  { %7106 = vperm.xlu0 %7269, %v7103_v32  }
 0x86d   :  { %v7107_v44 = vpop.permute.xlu0 %7106 }
 0x86e   :  { %v7109_v47 = vmul.f32 %v7107_v44, %v7095_v34  ;;  %v7110_v36 = vmul.f32 %v7107_v44, %v7096_v35  ;;  %v7111_v40 = vmul.f32 %v7107_v44, %v7097_v37  ;;  %v7112_v48 = vmul.f32 %v7107_v44, %v7098_v31 }
 0x86f   :  { %v7113_v56 = vmul.f32 %v7107_v44, %v7099_v38  ;;  %v7114_v46 = vmul.f32 %v7107_v44, %v7100_v39 }
 0x870   :  { %v7122_v52 = vadd.f32 %v7120_v49, %v7109_v47  ;;  %v7123_v57 = vadd.f32 %v7120_v49, %v7110_v36  ;;  %v7124_v62 = vadd.f32 %v7120_v49, %v7111_v40  ;;  %v7125_v53 = vadd.f32 %v7120_v49, %v7112_v48 }
 0x871   :  { %v7126_v63 = vadd.f32 %v7120_v49, %v7113_v56  ;;  %v7127_v8 = vadd.f32 %v7120_v49, %v7114_v46 }
 0x872   :  { %v7128_v14 = vmax.f32 %v7122_v52, 0.0  ;;  %v7129_v50 = vmax.f32 %v7123_v57, 0.0  ;;  %v7130_v60 = vmax.f32 %v7124_v62, 0.0  ;;  %v7131_v43 = vmax.f32 %v7125_v53, 0.0 }
 0x873   :  { %v7132_v54 = vmax.f32 %v7126_v63, 0.0  ;;  %v7133_v16 = vmax.f32 %v7127_v8, 0.0 }
 0x874   :  { %v7134_v18 = vmul.f32 %v7128_v14, %v7765_v42  ;;  %v7135_v0 = vmul.f32 %v7129_v50, %v7768_v55  ;;  %v7136_v51 = vmul.f32 %v7130_v60, %v7770_v58  ;;  %v7137_v59 = vmul.f32 %v7131_v43, %v7774_v15 }
 0x875   :  { %v7138_v61 = vmul.f32 %v7132_v54, %v7779_v2  ;;  %v7139_v7 = vmul.f32 %v7133_v16, %v7784_v9 }
 0x876   :  { %7140 = vst [vmem:[%s8463_s7] sm:$0xff] %v7134_v18  ;;  %7141 = vst [vmem:[%s8463_s7 + $0x8] sm:$0xff] %v7135_v0 }
 0x877   :  { %7142 = vst [vmem:[%s8463_s7 + $0x10] sm:$0xff] %v7136_v51  ;;  %7143 = vst [vmem:[%s8463_s7 + $0x18] sm:$0xff] %v7137_v59 }
 0x878   :  { %7144 = vst [vmem:[%s8463_s7 + $0x20] sm:$0xff] %v7138_v61  ;;  %7145 = vst.msk [vmem:[%s8463_s7 + $0x28] sm:$0xff] %vm2587_vm13, %v7139_v7 }

</bundles_post_ra>
